<compile_context>
chip_gen: v7x
topology: tpu7x:2x2x1
jax: 0.10.0
libtpu: 0.0.40
codegen_flags: <defaults>
</compile_context>

<pallas_src>
import jax
import jax.numpy as jnp
from jax.experimental import pallas as pl
from jax.experimental.pallas import tpu as pltpu

VMEM = pltpu.MemorySpace.VMEM
LANE = 128  # lane width / padding quantum


# ----------------------------- fused Pallas kernel -----------------------------

def _make_fused_kernel(num_layers):
    """Single kernel: pooler -> num_layers x (GCN, SAGE) -> Linear."""

    def kernel(*refs):
        f32, bf16 = jnp.float32, jnp.bfloat16
        o_ref = refs[-1]
        (counts_ref, tok_emb_ref, pool_w_ref, pool_b_ref,
         feat_ref, xa_ref, a_norm_ref, a_mean_ref) = refs[:8]
        lin_w_ref, lin_b_ref = refs[-3], refs[-2]

        # --- SciBERT stand-in pooler ---
        # TODO(synk): the full SciBERT transformer stack has no clean Pallas
        # equivalent here; this is a deterministic token-embedding mean-pool
        # (counts @ tok_emb on the MXU) + dense+tanh "pooler" producing the same
        # (N_paper, 768) pooler_output shape.
        pooled = jnp.dot(counts_ref[...], tok_emb_ref[...],
                         preferred_element_type=f32)
        pooled = jnp.tanh(
            jnp.dot(pooled.astype(bf16), pool_w_ref[...],
                    preferred_element_type=f32) + pool_b_ref[...])

        # xp = [pooler_output (768) | padded paper features (128)] -> lane-aligned.
        xp = jnp.concatenate([pooled.astype(bf16), feat_ref[...]], axis=1)
        xa = xa_ref[...]
        a_norm = a_norm_ref[...]
        a_mean = a_mean_ref[...]

        for l in range(num_layers):
            gcn_w = refs[8 + 4 * l][...]
            gcn_b = refs[9 + 4 * l][...]
            sage_w = refs[10 + 4 * l][...]
            sage_b = refs[11 + 4 * l][...]

            # GCNConv (author->author): relu( D^-1/2 (A+I) D^-1/2 @ (Xa @ W) + b )
            xw = jnp.dot(xa, gcn_w, preferred_element_type=f32).astype(bf16)
            xa_new = jnp.maximum(
                jnp.dot(a_norm, xw, preferred_element_type=f32) + gcn_b, 0.0)

            # SAGEConv (mean aggr, author->paper), fused into one MXU matmul:
            #   relu( [A_mean @ Xa | Xp] @ [Wl ; Wr] + bl )
            agg = jnp.dot(a_mean, xa, preferred_element_type=f32).astype(bf16)
            cat = jnp.concatenate([agg, xp], axis=1)
            xp_new = jnp.maximum(
                jnp.dot(cat, sage_w, preferred_element_type=f32) + sage_b, 0.0)

            # HeteroConv aggr='sum': each node type has exactly one relation, so
            # the sum reduces to the single relation output (then ReLU above).
            xa = xa_new.astype(bf16)
            xp = xp_new.astype(bf16)

        o_ref[...] = (jnp.dot(xp, lin_w_ref[...], preferred_element_type=f32)
                      + lin_b_ref[...])

    return kernel


# ------------------------- graph -> dense (JAX glue) -------------------------

def gcn_norm_dense(edge_index, n):
    """Dense D^-1/2 (A + I) D^-1/2 with M[dst, src] layout (GCNConv norm)."""
    src, dst = edge_index[0], edge_index[1]
    a = jnp.zeros((n, n), jnp.float32).at[dst, src].set(1.0)
    a = jnp.maximum(a, jnp.eye(n, dtype=jnp.float32))  # add self loops
    deg = a.sum(axis=1)
    dinv = jax.lax.rsqrt(deg)
    return a * dinv[:, None] * dinv[None, :]


def mean_adj_dense(edge_index, n_src, n_dst):
    """Row-normalized bipartite adjacency (dst, src); empty rows stay zero."""
    src, dst = edge_index[0], edge_index[1]
    a = jnp.zeros((n_dst, n_src), jnp.float32).at[dst, src].set(1.0)
    deg = a.sum(axis=1)
    return a / jnp.maximum(deg, 1.0)[:, None]


# ------------------------------ parameters ------------------------------

def _init_linear(key, fan_in, fan_out, bias=True):
    wkey, bkey = jax.random.split(key)
    scale = 1.0 / float(fan_in) ** 0.5
    w = jax.random.uniform(wkey, (fan_in, fan_out), jnp.float32, -scale, scale)
    b = (jax.random.uniform(bkey, (1, fan_out), jnp.float32, -scale, scale)
         if bias else None)
    return w, b


def init_params(key, *, author_dim, paper_dim, hidden, out, num_layers,
                vocab, emb):
    keys = jax.random.split(key, 3 + num_layers)
    tok_emb = jax.random.normal(keys[0], (vocab, emb), jnp.float32) * 0.02
    pool_w, pool_b = _init_linear(keys[1], emb, emb)
    convs = []
    a_in, p_in = author_dim, paper_dim
    for l in range(num_layers):
        k_gcn, k_sl, k_sr = jax.random.split(keys[2 + l], 3)
        gcn_w, gcn_b = _init_linear(k_gcn, a_in, hidden)
        sage_wl, sage_bl = _init_linear(k_sl, a_in, hidden)
        sage_wr, _ = _init_linear(k_sr, p_in, hidden, bias=False)
        convs.append(dict(gcn_w=gcn_w, gcn_b=gcn_b, sage_wl=sage_wl,
                          sage_bl=sage_bl, sage_wr=sage_wr))
        a_in, p_in = hidden, hidden
    lin_w, lin_b = _init_linear(keys[2 + num_layers], hidden, out)
    return dict(tok_emb=tok_emb, pool_w=pool_w, pool_b=pool_b,
                convs=convs, lin_w=lin_w, lin_b=lin_b)


# ------------------------ padding / bf16 preparation ------------------------

def _pad2d(x, rows, cols, dtype):
    out = jnp.zeros((rows, cols), dtype)
    return out.at[:x.shape[0], :x.shape[1]].set(x.astype(dtype))


def prepare_params(params, lane=LANE):
    """Cast weights to bf16 and zero-pad N (and concat-K) dims to lane multiples."""
    bf16, f32 = jnp.bfloat16, jnp.float32
    vocab, emb = params['tok_emb'].shape
    vocab_pad = pl.cdiv(vocab, lane) * lane

    prep = dict(
        tok_emb=_pad2d(params['tok_emb'], vocab_pad, emb, bf16),
        pool_w=params['pool_w'].astype(bf16),
        pool_b=params['pool_b'].astype(f32),
    )

    convs = []
    a_in_pad = lane          # layer-0 xa is padded to `lane` cols
    p_in_pad = emb + lane    # layer-0 xp = [pooled(emb) | padded features(lane)]
    for layer in params['convs']:
        gcn_w = _pad2d(layer['gcn_w'], a_in_pad, lane, bf16)
        gcn_b = _pad2d(layer['gcn_b'], 1, lane, f32)
        # Stack [Wl ; Wr] along K so the kernel does one matmul on [agg | xp].
        sage_w = jnp.zeros((a_in_pad + p_in_pad, lane), bf16)
        wl, wr = layer['sage_wl'], layer['sage_wr']
        sage_w = sage_w.at[:wl.shape[0], :wl.shape[1]].set(wl.astype(bf16))
        sage_w = sage_w.at[a_in_pad:a_in_pad + wr.shape[0], :wr.shape[1]].set(
            wr.astype(bf16))
        sage_b = _pad2d(layer['sage_bl'], 1, lane, f32)
        convs.append(dict(gcn_w=gcn_w, gcn_b=gcn_b, sage_w=sage_w, sage_b=sage_b))
        a_in_pad, p_in_pad = lane, lane  # subsequent layers: hidden padded to lane

    prep['convs'] = convs
    prep['lin_w'] = _pad2d(params['lin_w'], lane, lane, bf16)
    prep['lin_b'] = _pad2d(params['lin_b'], 1, lane, f32)
    prep['out_dim'] = params['lin_w'].shape[1]
    return prep


# ------------------------------ forward pass ------------------------------

def hetero_gnn_forward(params, x_dict, edge_index_dict):
    bf16, f32 = jnp.bfloat16, jnp.float32
    x_paper = x_dict['paper']
    x_author = x_dict['author']
    n_paper, n_author = x_paper.shape[0], x_author.shape[0]
    vocab, emb = params['tok_emb'].shape
    n_tokens = 350

    # x_dict['paper'][:, :350] are token ids, [:, 350:362] are features.
    paper_text = x_paper[:, :n_tokens].astype(jnp.int32)
    paper_features = x_paper[:, n_tokens:]

    # Token-count matrix replaces the (Np, 350, 768) gather intermediate:
    # mean token embedding == (counts / 350) @ tok_emb, done on the MXU in-kernel.
    # TODO(synk): only viable for a tiny vocab; real SciBERT vocab (~31k) needs
    # scalar-prefetched token ids + DMA row-gather of tok_emb from HBM instead.
    vocab_pad = pl.cdiv(vocab, LANE) * LANE
    counts = jax.nn.one_hot(paper_text, vocab_pad, dtype=f32).sum(axis=1)
    counts = (counts * (1.0 / n_tokens)).astype(bf16)

    # Lane-pad node features (zeros in padded columns are inert: matching
    # padded weight rows are zero).
    feat_pad = _pad2d(paper_features, n_paper, LANE, bf16)
    xa_pad = _pad2d(x_author, n_author, LANE, bf16)

    a_norm = gcn_norm_dense(
        edge_index_dict[('author', 'collaborates', 'author')],
        n_author).astype(bf16)
    a_mean = mean_adj_dense(
        edge_index_dict[('author', 'writes', 'paper')],
        n_author, n_paper).astype(bf16)
    # TODO(synk): dense adjacency is O(N^2); for realistic graphs switch to
    # scalar-prefetched CSR indices + DMA row gather / segment accumulation.

    prep = prepare_params(params)
    inputs = [counts, prep['tok_emb'], prep['pool_w'], prep['pool_b'],
              feat_pad, xa_pad, a_norm, a_mean]
    for layer in prep['convs']:
        inputs += [layer['gcn_w'], layer['gcn_b'],
                   layer['sage_w'], layer['sage_b']]
    inputs += [prep['lin_w'], prep['lin_b']]

    out_pad = pl.pallas_call(
        _make_fused_kernel(len(prep['convs'])),
        out_shape=jax.ShapeDtypeStruct((n_paper, LANE), f32),
        in_specs=[pl.BlockSpec(memory_space=VMEM)] * len(inputs),
        out_specs=pl.BlockSpec(memory_space=VMEM),
    )(*inputs)

    return out_pad[:, :prep['out_dim']]


# ----------------------------------- main -----------------------------------

if __name__ == "__main__":
    N_AUTHOR, N_PAPER = 16, 8
    AUTHOR_DIM = 16
    HIDDEN, OUT, NUM_LAYERS = 32, 8, 2
    VOCAB, EMB = 100, 768

    key = jax.random.PRNGKey(0)
    k1, k2, k3, k4, k5, kp = jax.random.split(key, 6)

    tok_ids = jax.random.randint(k1, (N_PAPER, 350), 0, VOCAB).astype(jnp.float32)
    paper_feats = jax.random.normal(k2, (N_PAPER, 12), jnp.float32)
    x_paper = jnp.concatenate([tok_ids, paper_feats], axis=1)   # (8, 362)
    x_author = jax.random.normal(k3, (N_AUTHOR, AUTHOR_DIM), jnp.float32)

    # author-collaborates-author (made symmetric) and author-writes-paper edges
    aa_s = jax.random.randint(k4, (24,), 0, N_AUTHOR)
    aa_d = jax.random.randint(jax.random.fold_in(k4, 1), (24,), 0, N_AUTHOR)
    edge_aa = jnp.stack([jnp.concatenate([aa_s, aa_d]),
                         jnp.concatenate([aa_d, aa_s])])
    wp_s = jax.random.randint(k5, (20,), 0, N_AUTHOR)
    wp_d = jax.random.randint(jax.random.fold_in(k5, 1), (20,), 0, N_PAPER)
    edge_wp = jnp.stack([wp_s, wp_d])

    params = init_params(kp, author_dim=AUTHOR_DIM, paper_dim=EMB + 12,
                         hidden=HIDDEN, out=OUT, num_layers=NUM_LAYERS,
                         vocab=VOCAB, emb=EMB)

    x_dict = {'paper': x_paper, 'author': x_author}
    edge_index_dict = {('author', 'collaborates', 'author'): edge_aa,
                       ('author', 'writes', 'paper'): edge_wp}

    out = hetero_gnn_forward(params, x_dict, edge_index_dict)
    out = jax.block_until_ready(out)
    assert out.shape == (N_PAPER, OUT) and out.dtype == jnp.float32
    print("KERNEL_OK")
</pallas_src>

<mosaic_0001>
module attributes {stable_mosaic.version = 11 : i64} {
  func.func @kernel(%arg0: memref<8x128xbf16, #tpu.memory_space<vmem>>, %arg1: memref<128x768xbf16, #tpu.memory_space<vmem>>, %arg2: memref<768x768xbf16, #tpu.memory_space<vmem>>, %arg3: memref<1x768xf32, #tpu.memory_space<vmem>>, %arg4: memref<8x128xbf16, #tpu.memory_space<vmem>>, %arg5: memref<16x128xbf16, #tpu.memory_space<vmem>>, %arg6: memref<16x16xbf16, #tpu.memory_space<vmem>>, %arg7: memref<8x16xbf16, #tpu.memory_space<vmem>>, %arg8: memref<128x128xbf16, #tpu.memory_space<vmem>>, %arg9: memref<1x128xf32, #tpu.memory_space<vmem>>, %arg10: memref<1024x128xbf16, #tpu.memory_space<vmem>>, %arg11: memref<1x128xf32, #tpu.memory_space<vmem>>, %arg12: memref<128x128xbf16, #tpu.memory_space<vmem>>, %arg13: memref<1x128xf32, #tpu.memory_space<vmem>>, %arg14: memref<256x128xbf16, #tpu.memory_space<vmem>>, %arg15: memref<1x128xf32, #tpu.memory_space<vmem>>, %arg16: memref<128x128xbf16, #tpu.memory_space<vmem>>, %arg17: memref<1x128xf32, #tpu.memory_space<vmem>>, %arg18: memref<8x128xf32, #tpu.memory_space<vmem>>) attributes {dimension_semantics = [], scalar_prefetch = 0 : i64, scratch_operands = 0 : i64, tpu.core_type = #tpu.core_type<tc>} {
    %c0 = arith.constant 0 : index
    %c0_0 = arith.constant 0 : index
    %0 = vector.load %arg0[%c0, %c0_0] : memref<8x128xbf16, #tpu.memory_space<vmem>>, vector<8x128xbf16>
    %c0_1 = arith.constant 0 : index
    %c0_2 = arith.constant 0 : index
    %1 = vector.load %arg1[%c0_1, %c0_2] : memref<128x768xbf16, #tpu.memory_space<vmem>>, vector<128x768xbf16>
    %cst = arith.constant dense<0.000000e+00> : vector<8x768xf32>
    %2 = tpu.matmul %0, %1, %cst {dimension_numbers = #tpu.dot_dimension_numbers<[1], [0], [0], [1], [0, 0, 1, 1], [], []>} : vector<8x128xbf16>, vector<128x768xbf16>, vector<8x768xf32> -> vector<8x768xf32>
    %3 = arith.truncf %2 : vector<8x768xf32> to vector<8x768xbf16>
    %c0_3 = arith.constant 0 : index
    %c0_4 = arith.constant 0 : index
    %4 = vector.load %arg2[%c0_3, %c0_4] : memref<768x768xbf16, #tpu.memory_space<vmem>>, vector<768x768xbf16>
    %cst_5 = arith.constant dense<0.000000e+00> : vector<8x768xf32>
    %5 = tpu.matmul %3, %4, %cst_5 {dimension_numbers = #tpu.dot_dimension_numbers<[1], [0], [0], [1], [0, 0, 1, 1], [], []>} : vector<8x768xbf16>, vector<768x768xbf16>, vector<8x768xf32> -> vector<8x768xf32>
    %c0_6 = arith.constant 0 : index
    %c0_7 = arith.constant 0 : index
    %6 = vector.load %arg3[%c0_6, %c0_7] : memref<1x768xf32, #tpu.memory_space<vmem>>, vector<1x768xf32>
    %7 = vector.broadcast %6 : vector<1x768xf32> to vector<8x768xf32>
    %8 = arith.addf %5, %7 : vector<8x768xf32>
    %9 = math.tanh %8 : vector<8x768xf32>
    %10 = arith.truncf %9 : vector<8x768xf32> to vector<8x768xbf16>
    %c0_8 = arith.constant 0 : index
    %c0_9 = arith.constant 0 : index
    %11 = vector.load %arg4[%c0_8, %c0_9] : memref<8x128xbf16, #tpu.memory_space<vmem>>, vector<8x128xbf16>
    %12 = tpu.concatenate %10, %11 in 1 : vector<8x768xbf16>, vector<8x128xbf16> -> vector<8x896xbf16>
    %c0_10 = arith.constant 0 : index
    %c0_11 = arith.constant 0 : index
    %13 = vector.load %arg5[%c0_10, %c0_11] : memref<16x128xbf16, #tpu.memory_space<vmem>>, vector<16x128xbf16>
    %c0_12 = arith.constant 0 : index
    %c0_13 = arith.constant 0 : index
    %14 = vector.load %arg6[%c0_12, %c0_13] : memref<16x16xbf16, #tpu.memory_space<vmem>>, vector<16x16xbf16>
    %c0_14 = arith.constant 0 : index
    %c0_15 = arith.constant 0 : index
    %15 = vector.load %arg7[%c0_14, %c0_15] : memref<8x16xbf16, #tpu.memory_space<vmem>>, vector<8x16xbf16>
    %c0_16 = arith.constant 0 : index
    %c0_17 = arith.constant 0 : index
    %16 = vector.load %arg8[%c0_16, %c0_17] : memref<128x128xbf16, #tpu.memory_space<vmem>>, vector<128x128xbf16>
    %c0_18 = arith.constant 0 : index
    %c0_19 = arith.constant 0 : index
    %17 = vector.load %arg9[%c0_18, %c0_19] : memref<1x128xf32, #tpu.memory_space<vmem>>, vector<1x128xf32>
    %c0_20 = arith.constant 0 : index
    %c0_21 = arith.constant 0 : index
    %18 = vector.load %arg10[%c0_20, %c0_21] : memref<1024x128xbf16, #tpu.memory_space<vmem>>, vector<1024x128xbf16>
    %c0_22 = arith.constant 0 : index
    %c0_23 = arith.constant 0 : index
    %19 = vector.load %arg11[%c0_22, %c0_23] : memref<1x128xf32, #tpu.memory_space<vmem>>, vector<1x128xf32>
    %cst_24 = arith.constant dense<0.000000e+00> : vector<16x128xf32>
    %20 = tpu.matmul %13, %16, %cst_24 {dimension_numbers = #tpu.dot_dimension_numbers<[1], [0], [0], [1], [0, 0, 1, 1], [], []>} : vector<16x128xbf16>, vector<128x128xbf16>, vector<16x128xf32> -> vector<16x128xf32>
    %21 = arith.truncf %20 : vector<16x128xf32> to vector<16x128xbf16>
    %cst_25 = arith.constant dense<0.000000e+00> : vector<16x128xf32>
    %22 = tpu.matmul %14, %21, %cst_25 {dimension_numbers = #tpu.dot_dimension_numbers<[1], [0], [0], [1], [0, 0, 1, 1], [], []>} : vector<16x16xbf16>, vector<16x128xbf16>, vector<16x128xf32> -> vector<16x128xf32>
    %23 = vector.broadcast %17 : vector<1x128xf32> to vector<16x128xf32>
    %24 = arith.addf %22, %23 : vector<16x128xf32>
    %cst_26 = arith.constant 0.000000e+00 : f32
    %25 = vector.broadcast %cst_26 : f32 to vector<16x128xf32>
    %26 = arith.maximumf %24, %25 : vector<16x128xf32>
    %cst_27 = arith.constant dense<0.000000e+00> : vector<8x128xf32>
    %27 = tpu.matmul %15, %13, %cst_27 {dimension_numbers = #tpu.dot_dimension_numbers<[1], [0], [0], [1], [0, 0, 1, 1], [], []>} : vector<8x16xbf16>, vector<16x128xbf16>, vector<8x128xf32> -> vector<8x128xf32>
    %28 = arith.truncf %27 : vector<8x128xf32> to vector<8x128xbf16>
    %29 = tpu.concatenate %28, %12 in 1 : vector<8x128xbf16>, vector<8x896xbf16> -> vector<8x1024xbf16>
    %cst_28 = arith.constant dense<0.000000e+00> : vector<8x128xf32>
    %30 = tpu.matmul %29, %18, %cst_28 {dimension_numbers = #tpu.dot_dimension_numbers<[1], [0], [0], [1], [0, 0, 1, 1], [], []>} : vector<8x1024xbf16>, vector<1024x128xbf16>, vector<8x128xf32> -> vector<8x128xf32>
    %31 = vector.broadcast %19 : vector<1x128xf32> to vector<8x128xf32>
    %32 = arith.addf %30, %31 : vector<8x128xf32>
    %cst_29 = arith.constant 0.000000e+00 : f32
    %33 = vector.broadcast %cst_29 : f32 to vector<8x128xf32>
    %34 = arith.maximumf %32, %33 : vector<8x128xf32>
    %35 = arith.truncf %26 : vector<16x128xf32> to vector<16x128xbf16>
    %36 = arith.truncf %34 : vector<8x128xf32> to vector<8x128xbf16>
    %c0_30 = arith.constant 0 : index
    %c0_31 = arith.constant 0 : index
    %37 = vector.load %arg14[%c0_30, %c0_31] : memref<256x128xbf16, #tpu.memory_space<vmem>>, vector<256x128xbf16>
    %c0_32 = arith.constant 0 : index
    %c0_33 = arith.constant 0 : index
    %38 = vector.load %arg15[%c0_32, %c0_33] : memref<1x128xf32, #tpu.memory_space<vmem>>, vector<1x128xf32>
    %cst_34 = arith.constant dense<0.000000e+00> : vector<8x128xf32>
    %39 = tpu.matmul %15, %35, %cst_34 {dimension_numbers = #tpu.dot_dimension_numbers<[1], [0], [0], [1], [0, 0, 1, 1], [], []>} : vector<8x16xbf16>, vector<16x128xbf16>, vector<8x128xf32> -> vector<8x128xf32>
    %40 = arith.truncf %39 : vector<8x128xf32> to vector<8x128xbf16>
    %41 = tpu.concatenate %40, %36 in 1 : vector<8x128xbf16>, vector<8x128xbf16> -> vector<8x256xbf16>
    %cst_35 = arith.constant dense<0.000000e+00> : vector<8x128xf32>
    %42 = tpu.matmul %41, %37, %cst_35 {dimension_numbers = #tpu.dot_dimension_numbers<[1], [0], [0], [1], [0, 0, 1, 1], [], []>} : vector<8x256xbf16>, vector<256x128xbf16>, vector<8x128xf32> -> vector<8x128xf32>
    %43 = vector.broadcast %38 : vector<1x128xf32> to vector<8x128xf32>
    %44 = arith.addf %42, %43 : vector<8x128xf32>
    %cst_36 = arith.constant 0.000000e+00 : f32
    %45 = vector.broadcast %cst_36 : f32 to vector<8x128xf32>
    %46 = arith.maximumf %44, %45 : vector<8x128xf32>
    %47 = arith.truncf %46 : vector<8x128xf32> to vector<8x128xbf16>
    %c0_37 = arith.constant 0 : index
    %c0_38 = arith.constant 0 : index
    %48 = vector.load %arg16[%c0_37, %c0_38] : memref<128x128xbf16, #tpu.memory_space<vmem>>, vector<128x128xbf16>
    %cst_39 = arith.constant dense<0.000000e+00> : vector<8x128xf32>
    %49 = tpu.matmul %47, %48, %cst_39 {dimension_numbers = #tpu.dot_dimension_numbers<[1], [0], [0], [1], [0, 0, 1, 1], [], []>} : vector<8x128xbf16>, vector<128x128xbf16>, vector<8x128xf32> -> vector<8x128xf32>
    %c0_40 = arith.constant 0 : index
    %c0_41 = arith.constant 0 : index
    %50 = vector.load %arg17[%c0_40, %c0_41] : memref<1x128xf32, #tpu.memory_space<vmem>>, vector<1x128xf32>
    %51 = vector.broadcast %50 : vector<1x128xf32> to vector<8x128xf32>
    %52 = arith.addf %49, %51 : vector<8x128xf32>
    %c0_42 = arith.constant 0 : index
    %c0_43 = arith.constant 0 : index
    %53 = vector.load %arg18[%c0_42, %c0_43] : memref<8x128xf32, #tpu.memory_space<vmem>>, vector<8x128xf32>
    tpu.vector_store %arg18[%c0_42, %c0_43], %52 {strides = array<i32>} : memref<8x128xf32, #tpu.memory_space<vmem>>, vector<8x128xf32>,
    return
  }
}

</mosaic_0001>

<bundles_post_ra>
// kernel: tpu_custom_call.1
= control target key start
LH: loop header
LB: loop body
LE: loop exit
PB: predicated region body
PF: predicated region fallthrough
CT: control target
= control target key end

     0   :  { %s6340_s0 = inlined_call_operand.hbm [shape: bf16[8,128], index: 0, kind: input, shape index: {}]   ;;  %s6341_s1 = inlined_call_operand.hbm [shape: bf16[128,768], index: 1, kind: input, shape index: {}]   ;;  %s6342_s2 = inlined_call_operand.hbm [shape: bf16[768,768], index: 2, kind: input, shape index: {}]   ;;  %s6343_s3 = inlined_call_operand.hbm [shape: f32[1,768], index: 3, kind: input, shape index: {}]   ;;  %s6344_s4 = inlined_call_operand.hbm [shape: bf16[8,128], index: 4, kind: input, shape index: {}]   ;;  %s6345_s5 = inlined_call_operand.hbm [shape: bf16[16,128], index: 5, kind: input, shape index: {}]   ;;  %s6346_s6 = inlined_call_operand.hbm [shape: bf16[16,16], index: 6, kind: input, shape index: {}]   ;;  %s6347_s7 = inlined_call_operand.hbm [shape: bf16[8,16], index: 7, kind: input, shape index: {}]   ;;  %s6348_s8 = inlined_call_operand.hbm [shape: bf16[128,128], index: 8, kind: input, shape index: {}]   ;;  %s6349_s9 = inlined_call_operand.hbm [shape: f32[1,128], index: 9, kind: input, shape index: {}]   ;;  %s6350_s10 = inlined_call_operand.hbm [shape: bf16[1024,128], index: 10, kind: input, shape index: {}]   ;;  %s6351_s11 = inlined_call_operand.hbm [shape: f32[1,128], index: 11, kind: input, shape index: {}]   ;;  %s6352_s12 = inlined_call_operand.hbm [shape: bf16[128,128], index: 12, kind: input, shape index: {}]   ;;  %s6353_s13 = inlined_call_operand.hbm [shape: f32[1,128], index: 13, kind: input, shape index: {}]   ;;  %s6354_s14 = inlined_call_operand.hbm [shape: bf16[256,128], index: 14, kind: input, shape index: {}]   ;;  %s6355_s15 = inlined_call_operand.hbm [shape: f32[1,128], index: 15, kind: input, shape index: {}]   ;;  %s6356_s16 = inlined_call_operand.hbm [shape: bf16[128,128], index: 16, kind: input, shape index: {}]   ;;  %s6357_s17 = inlined_call_operand.hbm [shape: f32[1,128], index: 17, kind: input, shape index: {}]   ;;  %s6358_s18 = inlined_call_operand.hbm [shape: f32[8,128], index: 18, kind: output, shape index: {}]  }
   0x1   :  { %6364 = sst [smem:[#allocation43_spill]] %s6340_s0 }
   0x2   :  { %6365 = sst [smem:[#allocation44_spill]] %s6341_s1 }
   0x3   :  { %6366 = sst [smem:[#allocation45_spill]] %s6342_s2 }
   0x4   :  { %6367 = sst [smem:[#allocation46_spill]] %s6357_s17 }
   0x5   :  { %6368 = sst [smem:[#allocation47_spill]] %s6358_s18 }
   0x6   :  { %23 = vsyncpa [#allocation3], 0 }
   0x7   :  { %24 = vsyncpa [#allocation6], 0 }
   0x8   :  { %25 = vsyncpa [#allocation9], 0 }
   0x9   :  { %26 = vsyncpa [#allocation12], 0 }
   0xa   :  { %27 = vsyncpa [#allocation15], 0 }
   0xb   :  { %28 = vsyncpa [#allocation18], 0 }
   0xc   :  { %29 = vsyncpa [#allocation21], 0 }
   0xd   :  { %30 = vsyncpa [#allocation24], 0 }
   0xe   :  { %31 = vsyncpa [#allocation27], 0 }
   0xf   :  { %32 = vsyncpa [#allocation30], 0 }
  0x10   :  { %33 = vsyncpa [#allocation4], 0  ;;  %s5846_s27 = smov [#allocation5]   ;;  %s6369_s0 = sld [smem:[#allocation44_spill]] }
  0x11   :  { %s49_s28 = sshll.u32 %s5846_s27, 4  ;;  %s50_s28 = int_to_ptr.vmem [resolvable:$true] %s49_s28 }
  0x16   :  { %s5406_s19 = scalar_lea.hbm %s6369_s0, 6144 }
  0x17   :  { %p5407_p0 = scmp.ne.s32.totalorder %s6369_s0, %s5406_s19  ;;  %p5410_p1 = scmp.lt.u32.totalorder %s5406_s19, %s6369_s0 }
  0x19   :  { %p5412_p2 = pnand %p5410_p1, %p5407_p0 }
  0x1b   :  { %5415 = shalt.err (!%p5412_p2)
}
  0x1c   :  { %s5416_s2 = scalar_lea.vmem %s50_s28, 6144  ;;  %p5421_p4 = scmp.lt.s32.totalorder %s50_s28, %s50_s28 }
  0x1d   :  { %p5417_p3 = scmp.ne.s32.totalorder %s50_s28, %s5416_s2  ;;  %p5422_p5 = scmp.lt.s32.totalorder %s5416_s2, %s5416_s2 }
  0x1f   :  { %p5423_p6 = por %p5422_p5, %p5421_p4 }
  0x21   :  { %p5424_p7 = pnand %p5423_p6, %p5417_p3 }
  0x23   :  { %5427 = shalt.err (!%p5424_p7)
}
  0x24   :  { %s5847_s23 = smov 384   ;;  %s5848_s24 = smov 24  }
  0x25   :  { %55 = dma.hbm_to_vmem [thread:$0]  %s6369_s0, 6144, %s50_s28, [#allocation6], %s5847_s23, %s5847_s23, %s5848_s24  }
  0x26   :  { %s5849_s27 = smov [#allocation8]   ;;  %s5850_s30 = smov [#allocation11]  }
  0x27   :  { %s74_s29 = sshll.u32 %s5849_s27, 4  ;;  %s93_s19 = sshll.u32 %s5850_s30, 4  ;;  %s75_s29 = int_to_ptr.vmem [resolvable:$true] %s74_s29  ;;  %s94_s19 = int_to_ptr.vmem [resolvable:$true] %s93_s19 }
  0x28   :  { %s5428_s21 = scalar_lea.hbm %s6343_s3, 96 }
  0x29   :  { %p5429_p8 = scmp.ne.s32.totalorder %s6343_s3, %s5428_s21  ;;  %p5432_p9 = scmp.lt.u32.totalorder %s5428_s21, %s6343_s3 }
  0x2b   :  { %p5434_p10 = pnand %p5432_p9, %p5429_p8 }
  0x2d   :  { %5437 = shalt.err (!%p5434_p10)
}
  0x2e   :  { %s5438_s28 = scalar_lea.vmem %s75_s29, 96  ;;  %p5443_p12 = scmp.lt.s32.totalorder %s75_s29, %s75_s29 }
  0x2f   :  { %p5439_p11 = scmp.ne.s32.totalorder %s75_s29, %s5438_s28  ;;  %p5444_p13 = scmp.lt.s32.totalorder %s5438_s28, %s5438_s28 }
  0x31   :  { %p5445_p0 = por %p5444_p13, %p5443_p12 }
  0x33   :  { %p5446_p1 = pnand %p5445_p0, %p5439_p11 }
  0x35   :  { %5449 = shalt.err (!%p5446_p1)
}
  0x36   :  { %77 = dma.hbm_to_vmem [thread:$0]  %s6343_s3, 96, %s75_s29, [#allocation9]  }
  0x37   :  { %s5450_s30 = scalar_lea.hbm %s6345_s5, 128 }
  0x38   :  { %p5451_p2 = scmp.ne.s32.totalorder %s6345_s5, %s5450_s30  ;;  %p5454_p3 = scmp.lt.u32.totalorder %s5450_s30, %s6345_s5 }
  0x3a   :  { %p5456_p4 = pnand %p5454_p3, %p5451_p2 }
  0x3c   :  { %5459 = shalt.err (!%p5456_p4)
}
  0x3d   :  { %s5460_s21 = scalar_lea.vmem %s94_s19, 128  ;;  %p5465_p6 = scmp.lt.s32.totalorder %s94_s19, %s94_s19 }
  0x3e   :  { %p5461_p5 = scmp.ne.s32.totalorder %s94_s19, %s5460_s21  ;;  %p5466_p7 = scmp.lt.s32.totalorder %s5460_s21, %s5460_s21 }
  0x40   :  { %p5467_p8 = por %p5466_p7, %p5465_p6 }
  0x42   :  { %p5468_p9 = pnand %p5467_p8, %p5461_p5 }
  0x44   :  { %5471 = shalt.err (!%p5468_p9)
}
  0x45   :  { %s5851_s3 = smov 64   ;;  %s5852_s29 = smov 4  }
  0x46   :  { %99 = dma.hbm_to_vmem [thread:$0]  %s6345_s5, 128, %s94_s19, [#allocation12], %s5851_s3, %s5851_s3, %s5852_s29  }
  0x47   :  { %s5853_s28 = smov [#allocation14]   ;;  %s5854_s25 = smov [#allocation17]  }
  0x48   :  { %s118_s0 = sshll.u32 %s5853_s28, 4  ;;  %s140_s26 = sshll.u32 %s5854_s25, 4  ;;  %s119_s0 = int_to_ptr.vmem [resolvable:$true] %s118_s0  ;;  %s141_s26 = int_to_ptr.vmem [resolvable:$true] %s140_s26 }
  0x49   :  { %s5472_s17 = scalar_lea.hbm %s6347_s7, 64 }
  0x4a   :  { %p5473_p10 = scmp.ne.s32.totalorder %s6347_s7, %s5472_s17  ;;  %p5476_p11 = scmp.lt.u32.totalorder %s5472_s17, %s6347_s7 }
  0x4c   :  { %p5478_p12 = pnand %p5476_p11, %p5473_p10 }
  0x4e   :  { %5481 = shalt.err (!%p5478_p12)
}
  0x4f   :  { %s5482_s5 = scalar_lea.vmem %s119_s0, 64  ;;  %p5487_p0 = scmp.lt.s32.totalorder %s119_s0, %s119_s0 }
  0x50   :  { %p5483_p13 = scmp.ne.s32.totalorder %s119_s0, %s5482_s5  ;;  %p5488_p1 = scmp.lt.s32.totalorder %s5482_s5, %s5482_s5 }
  0x52   :  { %p5489_p2 = por %p5488_p1, %p5487_p0 }
  0x54   :  { %p5490_p3 = pnand %p5489_p2, %p5483_p13 }
  0x56   :  { %5493 = shalt.err (!%p5490_p3)
}
  0x57   :  { %121 = dma.hbm_to_vmem [thread:$0]  %s6347_s7, 64, %s119_s0, [#allocation15]  }
  0x58   :  { %s5494_s25 = scalar_lea.hbm %s6349_s9, 16 }
  0x59   :  { %p5495_p4 = scmp.ne.s32.totalorder %s6349_s9, %s5494_s25  ;;  %p5498_p5 = scmp.lt.u32.totalorder %s5494_s25, %s6349_s9 }
  0x5b   :  { %p5500_p6 = pnand %p5498_p5, %p5495_p4 }
  0x5d   :  { %5503 = shalt.err (!%p5500_p6)
}
  0x5e   :  { %s5504_s1 = scalar_lea.vmem %s141_s26, 16  ;;  %s5508_s20 = scalar_lea.vmem %s141_s26, 32 }
  0x5f   :  { %p5505_p7 = scmp.ne.s32.totalorder %s141_s26, %s5504_s1  ;;  %p5509_p8 = scmp.lt.s32.totalorder %s141_s26, %s141_s26 }
  0x60   :  { %p5510_p9 = scmp.lt.s32.totalorder %s5508_s20, %s5504_s1 }
  0x62   :  { %p5511_p10 = por %p5510_p9, %p5509_p8 }
  0x64   :  { %p5512_p11 = pnand %p5511_p10, %p5505_p7 }
  0x66   :  { %5515 = shalt.err (!%p5512_p11)
}
  0x67   :  { %143 = dma.hbm_to_vmem [thread:$0]  %s6349_s9, 16, %s141_s26, [#allocation18]  }
  0x68   :  { %s5855_s21 = smov [#allocation20]   ;;  %s5856_s19 = smov [#allocation23]  }
  0x69   :  { %s162_s5 = sshll.u32 %s5855_s21, 4  ;;  %s184_s22 = sshll.u32 %s5856_s19, 4  ;;  %s163_s5 = int_to_ptr.vmem [resolvable:$true] %s162_s5  ;;  %s185_s22 = int_to_ptr.vmem [resolvable:$true] %s184_s22 }
  0x6a   :  { %s5516_s25 = scalar_lea.hbm %s6351_s11, 16 }
  0x6b   :  { %p5517_p12 = scmp.ne.s32.totalorder %s6351_s11, %s5516_s25  ;;  %p5520_p13 = scmp.lt.u32.totalorder %s5516_s25, %s6351_s11 }
  0x6d   :  { %p5522_p0 = pnand %p5520_p13, %p5517_p12 }
  0x6f   :  { %5525 = shalt.err (!%p5522_p0)
}
  0x70   :  { %s5526_s9 = scalar_lea.vmem %s163_s5, 16  ;;  %s5530_s26 = scalar_lea.vmem %s163_s5, 32 }
  0x71   :  { %p5527_p1 = scmp.ne.s32.totalorder %s163_s5, %s5526_s9  ;;  %p5531_p2 = scmp.lt.s32.totalorder %s163_s5, %s163_s5 }
  0x72   :  { %p5532_p3 = scmp.lt.s32.totalorder %s5530_s26, %s5526_s9 }
  0x74   :  { %p5533_p4 = por %p5532_p3, %p5531_p2 }
  0x76   :  { %p5534_p5 = pnand %p5533_p4, %p5527_p1 }
  0x78   :  { %5537 = shalt.err (!%p5534_p5)
}
  0x79   :  { %165 = dma.hbm_to_vmem [thread:$0]  %s6351_s11, 16, %s163_s5, [#allocation21]  }
  0x7a   :  { %s5538_s21 = scalar_lea.hbm %s6353_s13, 16 }
  0x7b   :  { %p5539_p6 = scmp.ne.s32.totalorder %s6353_s13, %s5538_s21  ;;  %p5542_p7 = scmp.lt.u32.totalorder %s5538_s21, %s6353_s13 }
  0x7d   :  { %p5544_p8 = pnand %p5542_p7, %p5539_p6 }
  0x7f   :  { %5547 = shalt.err (!%p5544_p8)
}
  0x80   :  { %s5548_s27 = scalar_lea.vmem %s185_s22, 16  ;;  %s5552_s30 = scalar_lea.vmem %s185_s22, 32 }
  0x81   :  { %p5549_p9 = scmp.ne.s32.totalorder %s185_s22, %s5548_s27  ;;  %p5553_p10 = scmp.lt.s32.totalorder %s185_s22, %s185_s22 }
  0x82   :  { %p5554_p11 = scmp.lt.s32.totalorder %s5552_s30, %s5548_s27 }
  0x84   :  { %p5555_p12 = por %p5554_p11, %p5553_p10 }
  0x86   :  { %p5556_p13 = pnand %p5555_p12, %p5549_p9 }
  0x88   :  { %5559 = shalt.err (!%p5556_p13)
}
  0x89   :  { %187 = dma.hbm_to_vmem [thread:$0]  %s6353_s13, 16, %s185_s22, [#allocation24]  }
  0x8a   :  { %s5857_s17 = smov [#allocation26]   ;;  %s5858_s9 = smov [#allocation2]  }
  0x8b   :  { %s206_s18 = sshll.u32 %s5857_s17, 4  ;;  %s40_s26 = sshll.u32 %s5858_s9, 4  ;;  %s207_s18 = int_to_ptr.vmem [resolvable:$true] %s206_s18  ;;  %s41_s26 = int_to_ptr.vmem [resolvable:$true] %s40_s26 }
  0x8c   :  { %s5560_s7 = scalar_lea.hbm %s6355_s15, 16 }
  0x8d   :  { %p5561_p0 = scmp.ne.s32.totalorder %s6355_s15, %s5560_s7  ;;  %p5564_p1 = scmp.lt.u32.totalorder %s5560_s7, %s6355_s15 }
  0x8f   :  { %p5566_p2 = pnand %p5564_p1, %p5561_p0 }
  0x91   :  { %5569 = shalt.err (!%p5566_p2)
}
  0x92   :  { %s5570_s13 = scalar_lea.vmem %s207_s18, 16  ;;  %s5574_s22 = scalar_lea.vmem %s207_s18, 32 }
  0x93   :  { %p5571_p3 = scmp.ne.s32.totalorder %s207_s18, %s5570_s13  ;;  %p5575_p4 = scmp.lt.s32.totalorder %s207_s18, %s207_s18 }
  0x94   :  { %p5576_p5 = scmp.lt.s32.totalorder %s5574_s22, %s5570_s13 }
  0x96   :  { %p5577_p6 = por %p5576_p5, %p5575_p4 }
  0x98   :  { %p5578_p7 = pnand %p5577_p6, %p5571_p3 }
  0x9a   :  { %5581 = shalt.err (!%p5578_p7)
}
  0x9b   :  { %209 = dma.hbm_to_vmem [thread:$0]  %s6355_s15, 16, %s207_s18, [#allocation27]  }
  0x9c   :  { %s6370_s11 = sld [smem:[#allocation43_spill]] }
  0xa2   :  { %s5582_s5 = scalar_lea.hbm %s6370_s11, 64 }
  0xa3   :  { %p5583_p8 = scmp.ne.s32.totalorder %s6370_s11, %s5582_s5  ;;  %p5586_p9 = scmp.lt.u32.totalorder %s5582_s5, %s6370_s11 }
  0xa5   :  { %p5588_p10 = pnand %p5586_p9, %p5583_p8 }
  0xa7   :  { %5591 = shalt.err (!%p5588_p10)
}
  0xa8   :  { %s5592_s7 = scalar_lea.vmem %s41_s26, 64  ;;  %p5597_p12 = scmp.lt.s32.totalorder %s41_s26, %s41_s26 }
  0xa9   :  { %p5593_p11 = scmp.ne.s32.totalorder %s41_s26, %s5592_s7  ;;  %p5598_p13 = scmp.lt.s32.totalorder %s5592_s7, %s5592_s7 }
  0xab   :  { %p5599_p0 = por %p5598_p13, %p5597_p12 }
  0xad   :  { %p5600_p1 = pnand %p5599_p0, %p5593_p11 }
  0xaf   :  { %5603 = shalt.err (!%p5600_p1)
}
  0xb0   :  { %43 = dma.hbm_to_vmem [thread:$0]  %s6370_s11, 64, %s41_s26, [#allocation3]  }
  0xb1   :  { %s5859_s0 = smov [#allocation7]   ;;  %s5860_s19 = smov [#allocation10]  }
  0xb2   :  { %s61_s21 = sshll.u32 %s5859_s0, 4  ;;  %s84_s2 = sshll.u32 %s5860_s19, 4  ;;  %s62_s21 = int_to_ptr.vmem [resolvable:$true] %s61_s21  ;;  %s85_s2 = int_to_ptr.vmem [resolvable:$true] %s84_s2 }
  0xb3   :  { %s6371_s28 = sld [smem:[#allocation45_spill]] }
  0xb9   :  { %s5604_s25 = scalar_lea.hbm %s6371_s28, 36864 }
  0xba   :  { %p5605_p2 = scmp.ne.s32.totalorder %s6371_s28, %s5604_s25  ;;  %p5608_p3 = scmp.lt.u32.totalorder %s5604_s25, %s6371_s28 }
  0xbc   :  { %p5610_p4 = pnand %p5608_p3, %p5605_p2 }
  0xbe   :  { %5613 = shalt.err (!%p5610_p4)
}
  0xbf   :  { %s5614_s26 = scalar_lea.vmem %s62_s21, 36864  ;;  %p5619_p6 = scmp.lt.s32.totalorder %s62_s21, %s62_s21 }
  0xc0   :  { %p5615_p5 = scmp.ne.s32.totalorder %s62_s21, %s5614_s26  ;;  %p5620_p7 = scmp.lt.s32.totalorder %s5614_s26, %s5614_s26 }
  0xc2   :  { %p5621_p8 = por %p5620_p7, %p5619_p6 }
  0xc4   :  { %p5622_p9 = pnand %p5621_p8, %p5615_p5 }
  0xc6   :  { %5625 = shalt.err (!%p5622_p9)
}
  0xc7   :  { %67 = dma.hbm_to_vmem [thread:$0]  %s6371_s28, 36864, %s62_s21, [#allocation6], %s5847_s23, %s5847_s23, %s5848_s24  }
  0xc8   :  { %s5626_s7 = scalar_lea.hbm %s6344_s4, 64 }
  0xc9   :  { %p5627_p10 = scmp.ne.s32.totalorder %s6344_s4, %s5626_s7  ;;  %p5630_p11 = scmp.lt.u32.totalorder %s5626_s7, %s6344_s4 }
  0xcb   :  { %p5632_p12 = pnand %p5630_p11, %p5627_p10 }
  0xcd   :  { %5635 = shalt.err (!%p5632_p12)
}
  0xce   :  { %s5636_s13 = scalar_lea.vmem %s85_s2, 64  ;;  %p5641_p0 = scmp.lt.s32.totalorder %s85_s2, %s85_s2 }
  0xcf   :  { %p5637_p13 = scmp.ne.s32.totalorder %s85_s2, %s5636_s13  ;;  %p5642_p1 = scmp.lt.s32.totalorder %s5636_s13, %s5636_s13 }
  0xd1   :  { %p5643_p2 = por %p5642_p1, %p5641_p0 }
  0xd3   :  { %p5644_p3 = pnand %p5643_p2, %p5637_p13 }
  0xd5   :  { %5647 = shalt.err (!%p5644_p3)
}
  0xd6   :  { %87 = dma.hbm_to_vmem [thread:$0]  %s6344_s4, 64, %s85_s2, [#allocation9]  }
  0xd7   :  { %s5861_s21 = smov [#allocation13]   ;;  %s5862_s28 = smov [#allocation16]  }
  0xd8   :  { %s105_s22 = sshll.u32 %s5861_s21, 4  ;;  %s127_s25 = sshll.u32 %s5862_s28, 4  ;;  %s106_s22 = int_to_ptr.vmem [resolvable:$true] %s105_s22  ;;  %s128_s25 = int_to_ptr.vmem [resolvable:$true] %s127_s25 }
  0xd9   :  { %s5648_s5 = scalar_lea.hbm %s6346_s6, 128 }
  0xda   :  { %p5649_p4 = scmp.ne.s32.totalorder %s6346_s6, %s5648_s5  ;;  %p5652_p5 = scmp.lt.u32.totalorder %s5648_s5, %s6346_s6 }
  0xdc   :  { %p5654_p6 = pnand %p5652_p5, %p5649_p4 }
  0xde   :  { %5657 = shalt.err (!%p5654_p6)
}
  0xdf   :  { %s5658_s4 = scalar_lea.vmem %s106_s22, 128  ;;  %p5663_p8 = scmp.lt.s32.totalorder %s106_s22, %s106_s22 }
  0xe0   :  { %p5659_p7 = scmp.ne.s32.totalorder %s106_s22, %s5658_s4  ;;  %p5664_p9 = scmp.lt.s32.totalorder %s5658_s4, %s5658_s4 }
  0xe2   :  { %p5665_p10 = por %p5664_p9, %p5663_p8 }
  0xe4   :  { %p5666_p11 = pnand %p5665_p10, %p5659_p7 }
  0xe6   :  { %5669 = shalt.err (!%p5666_p11)
}
  0xe7   :  { %111 = dma.hbm_to_vmem [thread:$0]  %s6346_s6, 128, %s106_s22, [#allocation12], %s5851_s3, %s5851_s3, %s5852_s29  }
  0xe8   :  { %s5670_s15 = scalar_lea.hbm %s6348_s8, 1024 }
  0xe9   :  { %p5671_p12 = scmp.ne.s32.totalorder %s6348_s8, %s5670_s15  ;;  %p5674_p13 = scmp.lt.u32.totalorder %s5670_s15, %s6348_s8 }
  0xeb   :  { %p5676_p0 = pnand %p5674_p13, %p5671_p12 }
  0xed   :  { %5679 = shalt.err (!%p5676_p0)
}
  0xee   :  { %s5680_s23 = scalar_lea.vmem %s128_s25, 1024  ;;  %p5685_p2 = scmp.lt.s32.totalorder %s128_s25, %s128_s25 }
  0xef   :  { %p5681_p1 = scmp.ne.s32.totalorder %s128_s25, %s5680_s23  ;;  %p5686_p3 = scmp.lt.s32.totalorder %s5680_s23, %s5680_s23 }
  0xf1   :  { %p5687_p4 = por %p5686_p3, %p5685_p2 }
  0xf3   :  { %p5688_p5 = pnand %p5687_p4, %p5681_p1 }
  0xf5   :  { %5691 = shalt.err (!%p5688_p5)
}
  0xf6   :  { %133 = dma.hbm_to_vmem [thread:$0]  %s6348_s8, 1024, %s128_s25, [#allocation15], %s5851_s3, %s5851_s3, %s5852_s29  }
  0xf7   :  { %s5863_s21 = smov [#allocation19]   ;;  %s5864_s28 = smov [#allocation22]  }
  0xf8   :  { %s149_s22 = sshll.u32 %s5863_s21, 4  ;;  %s171_s27 = sshll.u32 %s5864_s28, 4  ;;  %s150_s22 = int_to_ptr.vmem [resolvable:$true] %s149_s22  ;;  %s172_s27 = int_to_ptr.vmem [resolvable:$true] %s171_s27 }
  0xf9   :  { %s5692_s17 = scalar_lea.hbm %s6350_s10, 8192 }
  0xfa   :  { %p5693_p6 = scmp.ne.s32.totalorder %s6350_s10, %s5692_s17  ;;  %p5696_p7 = scmp.lt.u32.totalorder %s5692_s17, %s6350_s10 }
  0xfc   :  { %p5698_p8 = pnand %p5696_p7, %p5693_p6 }
  0xfe   :  { %5701 = shalt.err (!%p5698_p8)
}
  0xff   :  { %s5702_s8 = scalar_lea.vmem %s150_s22, 8192  ;;  %p5707_p10 = scmp.lt.s32.totalorder %s150_s22, %s150_s22 }
 0x100   :  { %p5703_p9 = scmp.ne.s32.totalorder %s150_s22, %s5702_s8  ;;  %p5708_p11 = scmp.lt.s32.totalorder %s5702_s8, %s5702_s8 }
 0x102   :  { %p5709_p12 = por %p5708_p11, %p5707_p10 }
 0x104   :  { %p5710_p13 = pnand %p5709_p12, %p5703_p9 }
 0x106   :  { %5713 = shalt.err (!%p5710_p13)
}
 0x107   :  { %155 = dma.hbm_to_vmem [thread:$0]  %s6350_s10, 8192, %s150_s22, [#allocation18], %s5851_s3, %s5851_s3, %s5852_s29  }
 0x108   :  { %s5714_s7 = scalar_lea.hbm %s6352_s12, 1024 }
 0x109   :  { %p5715_p0 = scmp.ne.s32.totalorder %s6352_s12, %s5714_s7  ;;  %p5718_p1 = scmp.lt.u32.totalorder %s5714_s7, %s6352_s12 }
 0x10b   :  { %p5720_p2 = pnand %p5718_p1, %p5715_p0 }
 0x10d   :  { %5723 = shalt.err (!%p5720_p2)
}
 0x10e   :  { %s5724_s13 = scalar_lea.vmem %s172_s27, 1024  ;;  %p5729_p4 = scmp.lt.s32.totalorder %s172_s27, %s172_s27 }
 0x10f   :  { %p5725_p3 = scmp.ne.s32.totalorder %s172_s27, %s5724_s13  ;;  %p5730_p5 = scmp.lt.s32.totalorder %s5724_s13, %s5724_s13 }
 0x111   :  { %p5731_p6 = por %p5730_p5, %p5729_p4 }
 0x113   :  { %p5732_p7 = pnand %p5731_p6, %p5725_p3 }
 0x115   :  { %5735 = shalt.err (!%p5732_p7)
}
 0x116   :  { %177 = dma.hbm_to_vmem [thread:$0]  %s6352_s12, 1024, %s172_s27, [#allocation21], %s5851_s3, %s5851_s3, %s5852_s29  }
 0x117   :  { %s5865_s6 = smov [#allocation25]   ;;  %s5866_s21 = smov [#allocation28]  }
 0x118   :  { %s193_s24 = sshll.u32 %s5865_s6, 4  ;;  %s215_s22 = sshll.u32 %s5866_s21, 4  ;;  %s194_s24 = int_to_ptr.vmem [resolvable:$true] %s193_s24  ;;  %s216_s22 = int_to_ptr.vmem [resolvable:$true] %s215_s22 }
 0x119   :  { %s5736_s5 = scalar_lea.hbm %s6354_s14, 2048 }
 0x11a   :  { %p5737_p8 = scmp.ne.s32.totalorder %s6354_s14, %s5736_s5  ;;  %p5740_p9 = scmp.lt.u32.totalorder %s5736_s5, %s6354_s14 }
 0x11c   :  { %p5742_p10 = pnand %p5740_p9, %p5737_p8 }
 0x11e   :  { %5745 = shalt.err (!%p5742_p10)
}
 0x11f   :  { %s5746_s12 = scalar_lea.vmem %s194_s24, 2048  ;;  %p5751_p12 = scmp.lt.s32.totalorder %s194_s24, %s194_s24 }
 0x120   :  { %p5747_p11 = scmp.ne.s32.totalorder %s194_s24, %s5746_s12  ;;  %p5752_p13 = scmp.lt.s32.totalorder %s5746_s12, %s5746_s12 }
 0x122   :  { %p5753_p0 = por %p5752_p13, %p5751_p12 }
 0x124   :  { %p5754_p1 = pnand %p5753_p0, %p5747_p11 }
 0x126   :  { %5757 = shalt.err (!%p5754_p1)
}
 0x127   :  { %199 = dma.hbm_to_vmem [thread:$0]  %s6354_s14, 2048, %s194_s24, [#allocation24], %s5851_s3, %s5851_s3, %s5852_s29  }
 0x128   :  { %s5758_s2 = scalar_lea.hbm %s6356_s16, 1024 }
 0x129   :  { %p5759_p2 = scmp.ne.s32.totalorder %s6356_s16, %s5758_s2  ;;  %p5762_p3 = scmp.lt.u32.totalorder %s5758_s2, %s6356_s16 }
 0x12b   :  { %p5764_p4 = pnand %p5762_p3, %p5759_p2 }
 0x12d   :  { %5767 = shalt.err (!%p5764_p4)
}
 0x12e   :  { %s5768_s18 = scalar_lea.vmem %s216_s22, 1024  ;;  %p5773_p6 = scmp.lt.s32.totalorder %s216_s22, %s216_s22 }
 0x12f   :  { %p5769_p5 = scmp.ne.s32.totalorder %s216_s22, %s5768_s18  ;;  %p5774_p7 = scmp.lt.s32.totalorder %s5768_s18, %s5768_s18 }
 0x131   :  { %p5775_p8 = por %p5774_p7, %p5773_p6 }
 0x133   :  { %p5776_p9 = pnand %p5775_p8, %p5769_p5 }
 0x135   :  { %5779 = shalt.err (!%p5776_p9)
}
 0x136   :  { %221 = dma.hbm_to_vmem [thread:$0]  %s6356_s16, 1024, %s216_s22, [#allocation27], %s5851_s3, %s5851_s3, %s5852_s29  }
 0x137   :  { %s5867_s19 = smov [#allocation29]   ;;  %s6372_s6 = sld [smem:[#allocation46_spill]] }
 0x138   :  { %s228_s13 = sshll.u32 %s5867_s19, 4  ;;  %s229_s13 = int_to_ptr.vmem [resolvable:$true] %s228_s13 }
 0x13d   :  { %s5780_s24 = scalar_lea.hbm %s6372_s6, 16 }
 0x13e   :  { %p5781_p10 = scmp.ne.s32.totalorder %s6372_s6, %s5780_s24  ;;  %p5784_p11 = scmp.lt.u32.totalorder %s5780_s24, %s6372_s6 }
 0x140   :  { %p5786_p12 = pnand %p5784_p11, %p5781_p10 }
 0x142   :  { %5789 = shalt.err (!%p5786_p12)
}
 0x143   :  { %s5790_s17 = scalar_lea.vmem %s229_s13, 16  ;;  %s5794_s16 = scalar_lea.vmem %s229_s13, 32 }
 0x144   :  { %p5791_p13 = scmp.ne.s32.totalorder %s229_s13, %s5790_s17  ;;  %p5795_p0 = scmp.lt.s32.totalorder %s229_s13, %s229_s13 }
 0x145   :  { %p5796_p1 = scmp.lt.s32.totalorder %s5794_s16, %s5790_s17 }
 0x147   :  { %p5797_p2 = por %p5796_p1, %p5795_p0 }
 0x149   :  { %p5798_p3 = pnand %p5797_p2, %p5791_p13 }
 0x14b   :  { %5801 = shalt.err (!%p5798_p3)
}
 0x14c   :  { %231 = dma.hbm_to_vmem [thread:$0]  %s6372_s6, 16, %s229_s13, [#allocation30]  }
 0x14d   :  { %5824 = dma.done.wait [#allocation3], 64  }
 0x14e   :  { %5825 = vsyncadd [#allocation3], 4294967232 }
 0x14f   :  { %5826 = dma.done.wait [#allocation6], 43008  }
 0x150   :  { %5827 = vsyncadd [#allocation6], 4294924288 }
 0x151   :  { %5828 = dma.done.wait [#allocation9], 160  }
 0x152   :  { %5829 = vsyncadd [#allocation9], 4294967136 }
 0x153   :  { %5830 = dma.done.wait [#allocation12], 256  }
 0x154   :  { %5831 = vsyncadd [#allocation12], 4294967040 }
 0x155   :  { %5832 = dma.done.wait [#allocation15], 1088  }
 0x156   :  { %5833 = vsyncadd [#allocation15], 4294966208 }
 0x157   :  { %5834 = dma.done.wait [#allocation18], 8208  }
 0x158   :  { %5835 = vsyncadd [#allocation18], 4294959088 }
 0x159   :  { %5836 = dma.done.wait [#allocation21], 1040  }
 0x15a   :  { %5837 = vsyncadd [#allocation21], 4294966256 }
 0x15b   :  { %5838 = dma.done.wait [#allocation24], 2064  }
 0x15c   :  { %5839 = vsyncadd [#allocation24], 4294965232 }
 0x15d   :  { %5840 = dma.done.wait [#allocation27], 1040  }
 0x15e   :  { %5841 = vsyncadd [#allocation27], 4294966256 }
 0x15f   :  { %5842 = dma.done.wait [#allocation30], 16  }
 0x160   :  { %5843 = vsyncadd [#allocation30], 4294967280  ;;  %v5868_v0 = vmov 0   ;;  %v4792_v1 = vld [vmem:[#allocation5 + $0x4] ss:$24 sps:$4 sm:$0xff]   ;;  %vm5870_vm0 = vmmov 0  }
 0x161   :  { %608 = vmatprep.mubr.bf16.mxu0 %v5868_v0  ;;  %649 = vmatprep.mubr.bf16.mxu1 %v5868_v0  ;;  %v4794_v2 = vld [vmem:[#allocation5] ss:$24 sps:$4 sm:$0xff]   ;;  %v4795_v3 = vld [vmem:[#allocation5 + $0x34] ss:$24 sps:$4 sm:$0xff]   ;;  %v4797_v4 = vld [vmem:[#allocation5 + $0x30] ss:$24 sps:$4 sm:$0xff]  }
 0x162   :  { %576 = vmatprep.subr.bf16.mxu0 %v4792_v1  ;;  %v4798_v5 = vld [vmem:[#allocation5 + $0x64] ss:$24 sps:$4 sm:$0xff]   ;;  %v4800_v6 = vld [vmem:[#allocation5 + $0x60] ss:$24 sps:$4 sm:$0xff]   ;;  %v4801_v7 = vld [vmem:[#allocation5 + $0x94] ss:$24 sps:$4 sm:$0xff]  }
 0x163   :  { %577 = vmatpush1.bf16.msra.mxu0 %v4794_v2  ;;  %v4803_v8 = vld [vmem:[#allocation5 + $0x90] ss:$24 sps:$4 sm:$0xff]   ;;  %v4804_v9 = vld [vmem:[#allocation5 + $0xc4] ss:$24 sps:$4 sm:$0xff]   ;;  %v4806_v13 = vld [vmem:[#allocation5 + $0xc0] ss:$24 sps:$4 sm:$0xff]  }
 0x164   :  { %578 = vmatprep.subr.bf16.mxu0 %v4795_v3  ;;  %v4816_v10 = vld [vmem:[#allocation5 + $0xc] ss:$24 sps:$4 sm:$0xff]   ;;  %v4818_v11 = vld [vmem:[#allocation5 + $0x8] ss:$24 sps:$4 sm:$0xff]   ;;  %v4819_v12 = vld [vmem:[#allocation5 + $0x3c] ss:$24 sps:$4 sm:$0xff]  }
 0x165   :  { %617 = vmatprep.subr.bf16.mxu1 %v4816_v10  ;;  %v4821_v14 = vld [vmem:[#allocation5 + $0x38] ss:$24 sps:$4 sm:$0xff]   ;;  %v4822_v15 = vld [vmem:[#allocation5 + $0x6c] ss:$24 sps:$4 sm:$0xff]   ;;  %v4824_v18 = vld [vmem:[#allocation5 + $0x68] ss:$24 sps:$4 sm:$0xff]  }
 0x166   :  { %618 = vmatpush1.bf16.msra.mxu1 %v4818_v11  ;;  %v4807_v16 = vld [vmem:[#allocation5 + $0xf4] ss:$24 sps:$4 sm:$0xff]   ;;  %v4809_v17 = vld [vmem:[#allocation5 + $0xf0] ss:$24 sps:$4 sm:$0xff]   ;;  %v4810_v20 = vld [vmem:[#allocation5 + $0x124] ss:$24 sps:$4 sm:$0xff]  }
 0x167   :  { %579 = vmatpush1.bf16.msra.mxu0 %v4797_v4  ;;  %619 = vmatprep.subr.bf16.mxu1 %v4819_v12  ;;  %v4825_v19 = vld [vmem:[#allocation5 + $0x9c] ss:$24 sps:$4 sm:$0xff]   ;;  %v4812_v21 = vld [vmem:[#allocation5 + $0x120] ss:$24 sps:$4 sm:$0xff]   ;;  %v4828_v23 = vld [vmem:[#allocation5 + $0xcc] ss:$24 sps:$4 sm:$0xff]  }
 0x168   :  { %580 = vmatprep.subr.bf16.mxu0 %v4798_v5  ;;  %v4827_v22 = vld [vmem:[#allocation5 + $0x98] ss:$24 sps:$4 sm:$0xff]   ;;  %v4813_v24 = vld [vmem:[#allocation5 + $0x154] ss:$24 sps:$4 sm:$0xff]   ;;  %v4830_v26 = vld [vmem:[#allocation5 + $0xc8] ss:$24 sps:$4 sm:$0xff]  }
 0x169   :  { %v4815_v25 = vld [vmem:[#allocation5 + $0x150] ss:$24 sps:$4 sm:$0xff]   ;;  %v4831_v27 = vld [vmem:[#allocation5 + $0xfc] ss:$24 sps:$4 sm:$0xff]   ;;  %v4834_v31 = vld [vmem:[#allocation5 + $0x12c] ss:$24 sps:$4 sm:$0xff]  }
 0x16a   :  { %620 = vmatpush1.bf16.msra.mxu1 %v4821_v14  ;;  %v4842_v28 = vld [vmem:[#allocation5 + $0x14] ss:$24 sps:$4 sm:$0xff]   ;;  %v6212_v29 = vld [vmem:[#allocation2] sm:$0xf]  ;;  %v4833_v30 = vld [vmem:[#allocation5 + $0xf8] ss:$24 sps:$4 sm:$0xff]  }
 0x16b   :  { %581 = vmatpush1.bf16.msra.mxu0 %v4800_v6  ;;  %621 = vmatprep.subr.bf16.mxu1 %v4822_v15  ;;  %v4840_v32 = vld [vmem:[#allocation5 + $0x10] ss:$24 sps:$4 sm:$0xff]   ;;  %v4845_v33 = vld [vmem:[#allocation5 + $0x44] ss:$24 sps:$4 sm:$0xff]   ;;  %v4843_v36 = vld [vmem:[#allocation5 + $0x40] ss:$24 sps:$4 sm:$0xff]  }
 0x16c   :  { %582 = vmatprep.subr.bf16.mxu0 %v4801_v7  ;;  %v4836_v34 = vld [vmem:[#allocation5 + $0x128] ss:$24 sps:$4 sm:$0xff]   ;;  %v4837_v35 = vld [vmem:[#allocation5 + $0x15c] ss:$24 sps:$4 sm:$0xff]   ;;  %v4839_v38 = vld [vmem:[#allocation5 + $0x158] ss:$24 sps:$4 sm:$0xff]  }
 0x16d   :  { %v4848_v37 = vld [vmem:[#allocation5 + $0x74] ss:$24 sps:$4 sm:$0xff]   ;;  %v4846_v39 = vld [vmem:[#allocation5 + $0x70] ss:$24 sps:$4 sm:$0xff]   ;;  %v4866_v40 = vld [vmem:[#allocation7 + $0x4] ss:$24 sps:$4 sm:$0xff]  }
 0x16e   :  { %622 = vmatpush1.bf16.msra.mxu1 %v4824_v18  ;;  %v4851_v41 = vld [vmem:[#allocation5 + $0xa4] ss:$24 sps:$4 sm:$0xff]   ;;  %v4849_v42 = vld [vmem:[#allocation5 + $0xa0] ss:$24 sps:$4 sm:$0xff]   ;;  %v4872_v44 = vld [vmem:[#allocation7 + $0x34] ss:$24 sps:$4 sm:$0xff]  }
 0x16f   :  { %583 = vmatpush1.bf16.msra.mxu0 %v4803_v8  ;;  %623 = vmatprep.subr.bf16.mxu1 %v4825_v19  ;;  %v4864_v43 = vld [vmem:[#allocation7] ss:$24 sps:$4 sm:$0xff]   ;;  %v4854_v45 = vld [vmem:[#allocation5 + $0xd4] ss:$24 sps:$4 sm:$0xff]   ;;  %v4852_v46 = vld [vmem:[#allocation5 + $0xd0] ss:$24 sps:$4 sm:$0xff]  }
 0x170   :  { %584 = vmatprep.subr.bf16.mxu0 %v4804_v9  ;;  %v4870_v47 = vld [vmem:[#allocation7 + $0x30] ss:$24 sps:$4 sm:$0xff]   ;;  %v4878_v48 = vld [vmem:[#allocation7 + $0x64] ss:$24 sps:$4 sm:$0xff]   ;;  %v4855_v50 = vld [vmem:[#allocation5 + $0x100] ss:$24 sps:$4 sm:$0xff]  }
 0x171   :  { %v4857_v49 = vld [vmem:[#allocation5 + $0x104] ss:$24 sps:$4 sm:$0xff]   ;;  %v4876_v51 = vld [vmem:[#allocation7 + $0x60] ss:$24 sps:$4 sm:$0xff]   ;;  %v4884_v52 = vld [vmem:[#allocation7 + $0x94] ss:$24 sps:$4 sm:$0xff]  }
 0x172   :  { %624 = vmatpush1.bf16.msra.mxu1 %v4827_v22  ;;  %v4860_v53 = vld [vmem:[#allocation5 + $0x134] ss:$24 sps:$4 sm:$0xff]   ;;  %v4858_v54 = vld [vmem:[#allocation5 + $0x130] ss:$24 sps:$4 sm:$0xff]   ;;  %v4890_v56 = vld [vmem:[#allocation7 + $0xc4] ss:$24 sps:$4 sm:$0xff]  }
 0x173   :  { %585 = vmatpush1.bf16.msra.mxu0 %v4806_v13  ;;  %625 = vmatprep.subr.bf16.mxu1 %v4828_v23  ;;  %v4882_v55 = vld [vmem:[#allocation7 + $0x90] ss:$24 sps:$4 sm:$0xff]   ;;  %v4863_v57 = vld [vmem:[#allocation5 + $0x164] ss:$24 sps:$4 sm:$0xff]   ;;  %v4861_v58 = vld [vmem:[#allocation5 + $0x160] ss:$24 sps:$4 sm:$0xff]  }
 0x174   :  { %586 = vmatprep.subr.bf16.mxu0 %v4807_v16  ;;  %v4888_v59 = vld [vmem:[#allocation7 + $0xc0] ss:$24 sps:$4 sm:$0xff]   ;;  %v4896_v60 = vld [vmem:[#allocation7 + $0xf4] ss:$24 sps:$4 sm:$0xff]   ;;  %v4894_v63 = vld [vmem:[#allocation7 + $0xf0] ss:$24 sps:$4 sm:$0xff]  }
 0x175   :  { %v4869_v61 = vld [vmem:[#allocation7 + $0xc] ss:$24 sps:$4 sm:$0xff]   ;;  %v4867_v62 = vld [vmem:[#allocation7 + $0x8] ss:$24 sps:$4 sm:$0xff]   ;;  %v4875_v1 = vld [vmem:[#allocation7 + $0x3c] ss:$24 sps:$4 sm:$0xff]  }
 0x176   :  { %626 = vmatpush1.bf16.msra.mxu1 %v4830_v26  ;;  %v4873_v2 = vld [vmem:[#allocation7 + $0x38] ss:$24 sps:$4 sm:$0xff]   ;;  %v4908_v4 = vld [vmem:[#allocation7 + $0x154] ss:$24 sps:$4 sm:$0xff]   ;;  %v4879_v6 = vld [vmem:[#allocation7 + $0x68] ss:$24 sps:$4 sm:$0xff]  }
 0x177   :  { %587 = vmatpush1.bf16.msra.mxu0 %v4809_v17  ;;  %627 = vmatprep.subr.bf16.mxu1 %v4831_v27  ;;  %v4900_v3 = vld [vmem:[#allocation7 + $0x120] ss:$24 sps:$4 sm:$0xff]   ;;  %v4881_v5 = vld [vmem:[#allocation7 + $0x6c] ss:$24 sps:$4 sm:$0xff]   ;;  %v4887_v7 = vld [vmem:[#allocation7 + $0x9c] ss:$24 sps:$4 sm:$0xff]  }
 0x178   :  { %588 = vmatprep.subr.bf16.mxu0 %v4810_v20  ;;  %v4906_v8 = vld [vmem:[#allocation7 + $0x150] ss:$24 sps:$4 sm:$0xff]   ;;  %v4914_v9 = vld [vmem:[#allocation7 + $0x184] ss:$24 sps:$4 sm:$0xff]   ;;  %v4912_v10 = vld [vmem:[#allocation7 + $0x180] ss:$24 sps:$4 sm:$0xff]  }
 0x179   :  { %v4885_v11 = vld [vmem:[#allocation7 + $0x98] ss:$24 sps:$4 sm:$0xff]   ;;  %v4920_v12 = vld [vmem:[#allocation7 + $0x1b4] ss:$24 sps:$4 sm:$0xff]   ;;  %v4891_v15 = vld [vmem:[#allocation7 + $0xc8] ss:$24 sps:$4 sm:$0xff]  }
 0x17a   :  { %628 = vmatpush1.bf16.msra.mxu1 %v4833_v30  ;;  %v4893_v13 = vld [vmem:[#allocation7 + $0xcc] ss:$24 sps:$4 sm:$0xff]   ;;  %v4918_v14 = vld [vmem:[#allocation7 + $0x1b0] ss:$24 sps:$4 sm:$0xff]   ;;  %v4899_v17 = vld [vmem:[#allocation7 + $0xfc] ss:$24 sps:$4 sm:$0xff]  }
 0x17b   :  { %589 = vmatpush1.bf16.msra.mxu0 %v4812_v21  ;;  %629 = vmatprep.subr.bf16.mxu1 %v4834_v31  ;;  %v4926_v16 = vld [vmem:[#allocation7 + $0x1e4] ss:$24 sps:$4 sm:$0xff]   ;;  %v4924_v18 = vld [vmem:[#allocation7 + $0x1e0] ss:$24 sps:$4 sm:$0xff]   ;;  %v4932_v20 = vld [vmem:[#allocation7 + $0x214] ss:$24 sps:$4 sm:$0xff]  }
 0x17c   :  { %590 = vmatprep.subr.bf16.mxu0 %v4813_v24  ;;  %v4897_v19 = vld [vmem:[#allocation7 + $0xf8] ss:$24 sps:$4 sm:$0xff]   ;;  %v4905_v21 = vld [vmem:[#allocation7 + $0x12c] ss:$24 sps:$4 sm:$0xff]   ;;  %v4903_v23 = vld [vmem:[#allocation7 + $0x128] ss:$24 sps:$4 sm:$0xff]  }
 0x17d   :  { %v4930_v22 = vld [vmem:[#allocation7 + $0x210] ss:$24 sps:$4 sm:$0xff]   ;;  %v4938_v24 = vld [vmem:[#allocation7 + $0x244] ss:$24 sps:$4 sm:$0xff]   ;;  %v4936_v26 = vld [vmem:[#allocation7 + $0x240] ss:$24 sps:$4 sm:$0xff]  }
 0x17e   :  { %630 = vmatpush1.bf16.msra.mxu1 %v4836_v34  ;;  %v4909_v27 = vld [vmem:[#allocation7 + $0x158] ss:$24 sps:$4 sm:$0xff]   ;;  %v4915_v31 = vld [vmem:[#allocation7 + $0x188] ss:$24 sps:$4 sm:$0xff]   ;;  %vm3105_vm1 = vcmask 130048   ;;  %s5871_s22 = smov [#allocation31]  }
 0x17f   :  { %591 = vmatpush1.bf16.msra.mxu0 %v4815_v25  ;;  %631 = vmatprep.subr.bf16.mxu1 %v4837_v35  ;;  %v4911_v25 = vld [vmem:[#allocation7 + $0x15c] ss:$24 sps:$4 sm:$0xff]   ;;  %v4942_v30 = vld [vmem:[#allocation7 + $0x270] ss:$24 sps:$4 sm:$0xff]   ;;  %v4948_v34 = vld [vmem:[#allocation7 + $0x2a0] ss:$24 sps:$4 sm:$0xff]  }
 0x180   :  { %658 = vmatprep.subr.bf16.mxu0 %v4842_v28  ;;  %v4944_v28 = vld [vmem:[#allocation7 + $0x274] ss:$24 sps:$4 sm:$0xff]   ;;  %v4921_v35 = vld [vmem:[#allocation7 + $0x1b8] ss:$24 sps:$4 sm:$0xff]   ;;  %s4085_s26 = sshll.u32 %s5871_s22, 4  ;;  %s4086_s26 = int_to_ptr.vmem [resolvable:$true] %s4085_s26 }
 0x181   :  { %s5802_s11 = scalar_lea.vmem %s4086_s26, 128  ;;  %p5807_p5 = scmp.lt.s32.totalorder %s4086_s26, %s4086_s26 }
 0x182   :  { %609 = vmatmul.mubr.bf16.vlgmr.msra.gmra.mrb[0].mxu0 %v6212_v29  ;;  %632 = vmatpush1.bf16.msra.mxu1 %v4839_v38  ;;  %v4935_v38 = vld [vmem:[#allocation7 + $0x21c] ss:$24 sps:$4 sm:$0xff]   ;;  %p5803_p4 = scmp.ne.s32.totalorder %s4086_s26, %s5802_s11  ;;  %p5808_p6 = scmp.lt.s32.totalorder %s5802_s11, %s5802_s11 }
 0x183   :  { %659 = vmatpush1.bf16.msra.mxu0 %v4840_v32  ;;  %690 = vmatprep.mubr.bf16.mxu0 %v5868_v0  ;;  %v4902_v0 = vld [vmem:[#allocation7 + $0x124] ss:$24 sps:$4 sm:$0xff]  }
 0x184   :  { %660 = vmatprep.subr.bf16.mxu0 %v4845_v33  ;;  %2465 = vmatprep.subr.bf16.mxu1 %v4866_v40  ;;  %v4950_v32 = vld [vmem:[#allocation7 + $0x2a4] ss:$24 sps:$4 sm:$0xff]   ;;  %p5809_p7 = por %p5808_p6, %p5807_p5 }
 0x185   :  { %650 = vmatmul.mubr.bf16.vlgmr.msra.gmra.mrb[0].mxu1 %v6212_v29  ;;  %v4923_v33 = vld [vmem:[#allocation7 + $0x1bc] ss:$24 sps:$4 sm:$0xff]   ;;  %v4941_v40 = vld [vmem:[#allocation7 + $0x24c] ss:$24 sps:$4 sm:$0xff]  }
 0x186   :  { %2466 = vmatpush1.bf16.msra.mxu1 %v4864_v43  ;;  %v4945_v43 = vld [vmem:[#allocation7 + $0x278] ss:$24 sps:$4 sm:$0xff]   ;;  %p5810_p8 = pnand %p5809_p7, %p5803_p4 }
 0x187   :  { %661 = vmatpush1.bf16.msra.mxu0 %v4843_v36  ;;  %2467 = vmatprep.subr.bf16.mxu1 %v4872_v44  ;;  %v4929_v36 = vld [vmem:[#allocation7 + $0x1ec] ss:$24 sps:$4 sm:$0xff]  }
 0x188   :  { %662 = vmatprep.subr.bf16.mxu0 %v4848_v37  ;;  %v4927_v37 = vld [vmem:[#allocation7 + $0x1e8] ss:$24 sps:$4 sm:$0xff]   ;;  %v4956_v44 = vld [vmem:[#allocation7 + $0x2d4] ss:$24 sps:$4 sm:$0xff]  }
 0x18a   :  { %2468 = vmatpush1.bf16.msra.mxu1 %v4870_v47  ;;  %v4951_v47 = vld [vmem:[#allocation7 + $0x2a8] ss:$24 sps:$4 sm:$0xff]  }
 0x18b   :  { %663 = vmatpush1.bf16.msra.mxu0 %v4846_v39  ;;  %2469 = vmatprep.subr.bf16.mxu1 %v4878_v48  ;;  %v4933_v39 = vld [vmem:[#allocation7 + $0x218] ss:$24 sps:$4 sm:$0xff]   ;;  %v4962_v48 = vld [vmem:[#allocation7 + $0x304] ss:$24 sps:$4 sm:$0xff]  }
 0x18c   :  { %664 = vmatprep.subr.bf16.mxu0 %v4851_v41  ;;  %v4939_v41 = vld [vmem:[#allocation7 + $0x248] ss:$24 sps:$4 sm:$0xff]  }
 0x18e   :  { %2470 = vmatpush1.bf16.msra.mxu1 %v4876_v51  ;;  %v4965_v51 = vld [vmem:[#allocation7 + $0x30c] ss:$24 sps:$4 sm:$0xff]  }
 0x18f   :  { %665 = vmatpush1.bf16.msra.mxu0 %v4849_v42  ;;  %2471 = vmatprep.subr.bf16.mxu1 %v4884_v52  ;;  %v4947_v42 = vld [vmem:[#allocation7 + $0x27c] ss:$24 sps:$4 sm:$0xff]  }
 0x190   :  { %666 = vmatprep.subr.bf16.mxu0 %v4854_v45  ;;  %v4953_v45 = vld [vmem:[#allocation7 + $0x2ac] ss:$24 sps:$4 sm:$0xff]  }
 0x192   :  { %2472 = vmatpush1.bf16.msra.mxu1 %v4882_v55 }
 0x193   :  { %667 = vmatpush1.bf16.msra.mxu0 %v4852_v46  ;;  %2473 = vmatprep.subr.bf16.mxu1 %v4890_v56  ;;  %v4954_v46 = vld [vmem:[#allocation7 + $0x2d0] ss:$24 sps:$4 sm:$0xff]   ;;  %v4968_v56 = vld [vmem:[#allocation7 + $0x334] ss:$24 sps:$4 sm:$0xff]  }
 0x194   :  { %668 = vmatprep.subr.bf16.mxu0 %v4857_v49  ;;  %v4959_v49 = vld [vmem:[#allocation7 + $0x2dc] ss:$24 sps:$4 sm:$0xff]  }
 0x196   :  { %2474 = vmatpush1.bf16.msra.mxu1 %v4888_v59 }
 0x197   :  { %669 = vmatpush1.bf16.msra.mxu0 %v4855_v50  ;;  %2475 = vmatprep.subr.bf16.mxu1 %v4896_v60  ;;  %v4957_v50 = vld [vmem:[#allocation7 + $0x2d8] ss:$24 sps:$4 sm:$0xff]  }
 0x198   :  { %670 = vmatprep.subr.bf16.mxu0 %v4860_v53  ;;  %v4960_v53 = vld [vmem:[#allocation7 + $0x300] ss:$24 sps:$4 sm:$0xff]  }
 0x19a   :  { %2476 = vmatpush1.bf16.msra.mxu1 %v4894_v63  ;;  %v4969_v63 = vld [vmem:[#allocation7 + $0x338] ss:$24 sps:$4 sm:$0xff]  }
 0x19b   :  { %671 = vmatpush1.bf16.msra.mxu0 %v4858_v54  ;;  %2477 = vmatprep.subr.bf16.mxu1 %v4902_v0  ;;  %v4963_v54 = vld [vmem:[#allocation7 + $0x308] ss:$24 sps:$4 sm:$0xff]   ;;  %v4974_v0 = vld [vmem:[#allocation7 + $0x364] ss:$24 sps:$4 sm:$0xff]  }
 0x19c   :  { %672 = vmatprep.subr.bf16.mxu0 %v4863_v57 }
 0x19e   :  { %2478 = vmatpush1.bf16.msra.mxu1 %v4900_v3  ;;  %v4975_v3 = vld [vmem:[#allocation7 + $0x368] ss:$24 sps:$4 sm:$0xff]  }
 0x19f   :  { %673 = vmatpush1.bf16.msra.mxu0 %v4861_v58  ;;  %2479 = vmatprep.subr.bf16.mxu1 %v4908_v4  ;;  %v4980_v4 = vld [vmem:[#allocation7 + $0x394] ss:$24 sps:$4 sm:$0xff]  }
 0x1a0   :  { %2588 = vmatprep.subr.bf16.mxu0 %v4869_v61  ;;  %v4971_v61 = vld [vmem:[#allocation7 + $0x33c] ss:$24 sps:$4 sm:$0xff]  }
 0x1a2   :  { %691 = vmatmul.mubr.bf16.vlgmr.msra.gmra.mrb[4].mxu0 %v6212_v29  ;;  %2480 = vmatpush1.bf16.msra.mxu1 %v4906_v8  ;;  %v4917_v29 = vld [vmem:[#allocation7 + $0x18c] ss:$24 sps:$4 sm:$0xff]   ;;  %v4981_v8 = vld [vmem:[#allocation7 + $0x398] ss:$24 sps:$4 sm:$0xff]  }
 0x1a3   :  { %2589 = vmatpush1.bf16.msra.mxu0 %v4867_v62  ;;  %2481 = vmatprep.subr.bf16.mxu1 %v4914_v9  ;;  %v4966_v62 = vld [vmem:[#allocation7 + $0x330] ss:$24 sps:$4 sm:$0xff]  }
 0x1a4   :  { %2590 = vmatprep.subr.bf16.mxu0 %v4875_v1  ;;  %v4977_v1 = vld [vmem:[#allocation7 + $0x36c] ss:$24 sps:$4 sm:$0xff]  }
 0x1a6   :  { %2482 = vmatpush1.bf16.msra.mxu1 %v4912_v10 }
 0x1a7   :  { %2591 = vmatpush1.bf16.msra.mxu0 %v4873_v2  ;;  %2483 = vmatprep.subr.bf16.mxu1 %v4920_v12  ;;  %v4972_v2 = vld [vmem:[#allocation7 + $0x360] ss:$24 sps:$4 sm:$0xff]  }
 0x1a8   :  { %2592 = vmatprep.subr.bf16.mxu0 %v4881_v5  ;;  %v4983_v5 = vld [vmem:[#allocation7 + $0x39c] ss:$24 sps:$4 sm:$0xff]  }
 0x1aa   :  { %2484 = vmatpush1.bf16.msra.mxu1 %v4918_v14  ;;  %v4989_v14 = vld [vmem:[#allocation7 + $0x3cc] ss:$24 sps:$4 sm:$0xff]  }
 0x1ab   :  { %2593 = vmatpush1.bf16.msra.mxu0 %v4879_v6  ;;  %2485 = vmatprep.subr.bf16.mxu1 %v4926_v16  ;;  %v4987_v16 = vld [vmem:[#allocation7 + $0x3c8] ss:$24 sps:$4 sm:$0xff]  }
 0x1ac   :  { %2594 = vmatprep.subr.bf16.mxu0 %v4887_v7  ;;  %v4978_v7 = vld [vmem:[#allocation7 + $0x390] ss:$24 sps:$4 sm:$0xff]  }
 0x1ae   :  { %2486 = vmatpush1.bf16.msra.mxu1 %v4924_v18  ;;  %v4995_v18 = vld [vmem:[#allocation7 + $0x3fc] ss:$24 sps:$4 sm:$0xff]  }
 0x1af   :  { %2595 = vmatpush1.bf16.msra.mxu0 %v4885_v11  ;;  %2487 = vmatprep.subr.bf16.mxu1 %v4932_v20  ;;  %v4993_v20 = vld [vmem:[#allocation7 + $0x3f8] ss:$24 sps:$4 sm:$0xff]  }
 0x1b0   :  { %2596 = vmatprep.subr.bf16.mxu0 %v4893_v13  ;;  %v4986_v13 = vld [vmem:[#allocation7 + $0x3c4] ss:$24 sps:$4 sm:$0xff]  }
 0x1b2   :  { %2488 = vmatpush1.bf16.msra.mxu1 %v4930_v22  ;;  %v5001_v22 = vld [vmem:[#allocation7 + $0x42c] ss:$24 sps:$4 sm:$0xff]  }
 0x1b3   :  { %2597 = vmatpush1.bf16.msra.mxu0 %v4891_v15  ;;  %2489 = vmatprep.subr.bf16.mxu1 %v4938_v24  ;;  %v4984_v15 = vld [vmem:[#allocation7 + $0x3c0] ss:$24 sps:$4 sm:$0xff]  }
 0x1b4   :  { %2598 = vmatprep.subr.bf16.mxu0 %v4899_v17  ;;  %v4992_v17 = vld [vmem:[#allocation7 + $0x3f4] ss:$24 sps:$4 sm:$0xff]   ;;  %v4999_v24 = vld [vmem:[#allocation7 + $0x428] ss:$24 sps:$4 sm:$0xff]  }
 0x1b6   :  { %2490 = vmatpush1.bf16.msra.mxu1 %v4936_v26  ;;  %v5007_v26 = vld [vmem:[#allocation7 + $0x45c] ss:$24 sps:$4 sm:$0xff]  }
 0x1b7   :  { %2599 = vmatpush1.bf16.msra.mxu0 %v4897_v19  ;;  %2491 = vmatprep.subr.bf16.mxu1 %v4944_v28  ;;  %v4990_v19 = vld [vmem:[#allocation7 + $0x3f0] ss:$24 sps:$4 sm:$0xff]  }
 0x1b8   :  { %2600 = vmatprep.subr.bf16.mxu0 %v4905_v21  ;;  %v4998_v21 = vld [vmem:[#allocation7 + $0x424] ss:$24 sps:$4 sm:$0xff]   ;;  %v5005_v28 = vld [vmem:[#allocation7 + $0x458] ss:$24 sps:$4 sm:$0xff]  }
 0x1ba   :  { %2492 = vmatpush1.bf16.msra.mxu1 %v4942_v30  ;;  %v5013_v30 = vld [vmem:[#allocation7 + $0x48c] ss:$24 sps:$4 sm:$0xff]  }
 0x1bb   :  { %2601 = vmatpush1.bf16.msra.mxu0 %v4903_v23  ;;  %2493 = vmatprep.subr.bf16.mxu1 %v4950_v32  ;;  %v4996_v23 = vld [vmem:[#allocation7 + $0x420] ss:$24 sps:$4 sm:$0xff]  }
 0x1bc   :  { %2602 = vmatprep.subr.bf16.mxu0 %v4911_v25  ;;  %v5004_v25 = vld [vmem:[#allocation7 + $0x454] ss:$24 sps:$4 sm:$0xff]  }
 0x1be   :  { %2494 = vmatpush1.bf16.msra.mxu1 %v4948_v34  ;;  %v5011_v34 = vld [vmem:[#allocation7 + $0x488] ss:$24 sps:$4 sm:$0xff]  }
 0x1bf   :  { %2603 = vmatpush1.bf16.msra.mxu0 %v4909_v27  ;;  %2495 = vmatprep.subr.bf16.mxu1 %v4956_v44  ;;  %v5002_v27 = vld [vmem:[#allocation7 + $0x450] ss:$24 sps:$4 sm:$0xff]  }
 0x1c0   :  { %2604 = vmatprep.subr.bf16.mxu0 %v4917_v29  ;;  %v5010_v29 = vld [vmem:[#allocation7 + $0x484] ss:$24 sps:$4 sm:$0xff]   ;;  %v5023_v44 = vld [vmem:[#allocation7 + $0x4e8] ss:$24 sps:$4 sm:$0xff]  }
 0x1c2   :  { %2496 = vmatpush1.bf16.msra.mxu1 %v4954_v46  ;;  %v5031_v46 = vld [vmem:[#allocation7 + $0x51c] ss:$24 sps:$4 sm:$0xff]  }
 0x1c3   :  { %2605 = vmatpush1.bf16.msra.mxu0 %v4915_v31  ;;  %2506 = vmatprep.subr.bf16.mxu1 %v4962_v48  ;;  %v5029_v48 = vld [vmem:[#allocation7 + $0x518] ss:$24 sps:$4 sm:$0xff]  }
 0x1c4   :  { %2606 = vmatprep.subr.bf16.mxu0 %v4923_v33  ;;  %v5008_v33 = vld [vmem:[#allocation7 + $0x480] ss:$24 sps:$4 sm:$0xff]  }
 0x1c7   :  { %2607 = vmatpush1.bf16.msra.mxu0 %v4921_v35 }
 0x1c8   :  { %2608 = vmatprep.subr.bf16.mxu0 %v4929_v36  ;;  %v5016_v36 = vld [vmem:[#allocation7 + $0x4b4] ss:$24 sps:$4 sm:$0xff]  }
 0x1cb   :  { %2609 = vmatpush1.bf16.msra.mxu0 %v4927_v37  ;;  %v5019_v37 = vld [vmem:[#allocation7 + $0x4bc] ss:$24 sps:$4 sm:$0xff]  }
 0x1cc   :  { %2610 = vmatprep.subr.bf16.mxu0 %v4935_v38 }
 0x1cf   :  { %2611 = vmatpush1.bf16.msra.mxu0 %v4933_v39  ;;  %v5014_v39 = vld [vmem:[#allocation7 + $0x4b0] ss:$24 sps:$4 sm:$0xff]  }
 0x1d0   :  { %2612 = vmatprep.subr.bf16.mxu0 %v4941_v40  ;;  %v5017_v40 = vld [vmem:[#allocation7 + $0x4b8] ss:$24 sps:$4 sm:$0xff]  }
 0x1d3   :  { %2613 = vmatpush1.bf16.msra.mxu0 %v4939_v41  ;;  %v5022_v41 = vld [vmem:[#allocation7 + $0x4e4] ss:$24 sps:$4 sm:$0xff]  }
 0x1d4   :  { %2614 = vmatprep.subr.bf16.mxu0 %v4947_v42  ;;  %v5025_v42 = vld [vmem:[#allocation7 + $0x4ec] ss:$24 sps:$4 sm:$0xff]  }
 0x1d7   :  { %2615 = vmatpush1.bf16.msra.mxu0 %v4945_v43  ;;  %v5020_v43 = vld [vmem:[#allocation7 + $0x4e0] ss:$24 sps:$4 sm:$0xff]  }
 0x1d8   :  { %2616 = vmatprep.subr.bf16.mxu0 %v4953_v45  ;;  %v5028_v45 = vld [vmem:[#allocation7 + $0x514] ss:$24 sps:$4 sm:$0xff]  }
 0x1db   :  { %2617 = vmatpush1.bf16.msra.mxu0 %v4951_v47  ;;  %v5026_v47 = vld [vmem:[#allocation7 + $0x510] ss:$24 sps:$4 sm:$0xff]  }
 0x1dc   :  { %2618 = vmatprep.subr.bf16.mxu0 %v4959_v49  ;;  %v5034_v49 = vld [vmem:[#allocation7 + $0x544] ss:$24 sps:$4 sm:$0xff]  }
 0x1df   :  { %2619 = vmatpush1.bf16.msra.mxu0 %v4957_v50  ;;  %v5037_v50 = vld [vmem:[#allocation7 + $0x54c] ss:$24 sps:$4 sm:$0xff]  }
 0x1e0   :  { %2629 = vmatprep.subr.bf16.mxu0 %v4965_v51  ;;  %v5032_v51 = vld [vmem:[#allocation7 + $0x540] ss:$24 sps:$4 sm:$0xff]  }
 0x255   :  { %v610_v52 = vpop.f32.mrb[0].mxu0 }
 0x256   :  { %v612_v55 = vpop.f32.mrb[1].mxu0  ;;  %v6220_v59 = vpack.c.bf16 %v610_v52, %v610_v52  ;;  %v5035_v52 = vld [vmem:[#allocation7 + $0x548] ss:$24 sps:$4 sm:$0xff]  }
 0x257   :  { %v6218_v57 = vpack.c.bf16 %v612_v55, %v612_v55  ;;  %v614_v58 = vpop.f32.mrb[2].mxu0  ;;  %v5038_v55 = vld [vmem:[#allocation7 + $0x570] ss:$24 sps:$4 sm:$0xff]  }
 0x258   :  { %v615_v60 = vpop.f32.mrb[3].mxu0  ;;  %v6226_v6 = vpop.f32.mrb[0].mxu1  ;;  %v5046_v58 = vld [vmem:[#allocation7 + $0x5a4] ss:$24 sps:$4 sm:$0xff]  }
 0x259   :  { %2497 = vmatprep.mubr.bf16.mxu1 %v6218_v57  ;;  %2620 = vmatprep.mubr.bf16.mxu0 %v6218_v57  ;;  %v653_v9 = vpop.f32.mrb[1].mxu1  ;;  %v5049_v60 = vld [vmem:[#allocation7 + $0x5ac] ss:$24 sps:$4 sm:$0xff]  }
 0x25a   :  { %2498 = vmatmul.mubr.bf16.vlgmr.msra.gmra.mrb[4].mxu1 %v6220_v59  ;;  %2621 = vmatmul.mubr.bf16.vlgmr.msra.gmra.mrb[8].mxu0 %v6220_v59  ;;  %v6228_v10 = vpack.c.bf16 %v653_v9, %v653_v9  ;;  %v655_v11 = vpop.f32.mrb[2].mxu1  ;;  %v5064_v9 = vld [vmem:[#allocation7 + $0x634] ss:$24 sps:$4 sm:$0xff]  }
 0x25b   :  { %2507 = vmatpush1.bf16.msra.mxu1 %v4960_v53  ;;  %2630 = vmatpush1.bf16.msra.mxu0 %v4963_v54  ;;  %v656_v12 = vpop.f32.mrb[3].mxu1  ;;  %v5040_v53 = vld [vmem:[#allocation7 + $0x574] ss:$24 sps:$4 sm:$0xff]  }
 0x25c   :  { %2508 = vmatprep.subr.bf16.mxu1 %v4968_v56  ;;  %2631 = vmatprep.subr.bf16.mxu0 %v4971_v61  ;;  %v5043_v54 = vld [vmem:[#allocation7 + $0x57c] ss:$24 sps:$4 sm:$0xff]   ;;  %v5041_v56 = vld [vmem:[#allocation7 + $0x578] ss:$24 sps:$4 sm:$0xff]  }
 0x25d   :  { %2538 = vmatprep.mubr.bf16.mxu1 %v6228_v10  ;;  %2661 = vmatprep.mubr.bf16.mxu0 %v6228_v10  ;;  %v5044_v61 = vld [vmem:[#allocation7 + $0x5a0] ss:$24 sps:$4 sm:$0xff]   ;;  %v5067_v11 = vld [vmem:[#allocation7 + $0x63c] ss:$24 sps:$4 sm:$0xff]  }
 0x25f   :  { %2509 = vmatpush1.bf16.msra.mxu1 %v4966_v62  ;;  %2632 = vmatpush1.bf16.msra.mxu0 %v4969_v63  ;;  %v5047_v62 = vld [vmem:[#allocation7 + $0x5a8] ss:$24 sps:$4 sm:$0xff]   ;;  %v5052_v63 = vld [vmem:[#allocation7 + $0x5d4] ss:$24 sps:$4 sm:$0xff]  }
 0x260   :  { %2510 = vmatprep.subr.bf16.mxu1 %v4974_v0  ;;  %2633 = vmatprep.subr.bf16.mxu0 %v4977_v1  ;;  %v5055_v0 = vld [vmem:[#allocation7 + $0x5dc] ss:$24 sps:$4 sm:$0xff]   ;;  %v5050_v1 = vld [vmem:[#allocation7 + $0x5d0] ss:$24 sps:$4 sm:$0xff]  }
 0x263   :  { %2511 = vmatpush1.bf16.msra.mxu1 %v4972_v2  ;;  %2634 = vmatpush1.bf16.msra.mxu0 %v4975_v3  ;;  %v5053_v2 = vld [vmem:[#allocation7 + $0x5d8] ss:$24 sps:$4 sm:$0xff]   ;;  %v5058_v3 = vld [vmem:[#allocation7 + $0x604] ss:$24 sps:$4 sm:$0xff]  }
 0x264   :  { %2512 = vmatprep.subr.bf16.mxu1 %v4980_v4  ;;  %2635 = vmatprep.subr.bf16.mxu0 %v4983_v5  ;;  %v5061_v4 = vld [vmem:[#allocation7 + $0x60c] ss:$24 sps:$4 sm:$0xff]   ;;  %v6238_v5 = vpack.c.bf16 %v6226_v6, %v6226_v6  ;;  %v5062_v6 = vld [vmem:[#allocation7 + $0x630] ss:$24 sps:$4 sm:$0xff]  }
 0x267   :  { %2513 = vmatpush1.bf16.msra.mxu1 %v4978_v7  ;;  %2636 = vmatpush1.bf16.msra.mxu0 %v4981_v8  ;;  %v5056_v7 = vld [vmem:[#allocation7 + $0x600] ss:$24 sps:$4 sm:$0xff]  }
 0x268   :  { %2514 = vmatprep.subr.bf16.mxu1 %v4986_v13  ;;  %2637 = vmatprep.subr.bf16.mxu0 %v4989_v14  ;;  %v5059_v8 = vld [vmem:[#allocation7 + $0x608] ss:$24 sps:$4 sm:$0xff]   ;;  %v5065_v13 = vld [vmem:[#allocation7 + $0x638] ss:$24 sps:$4 sm:$0xff]   ;;  %v5070_v14 = vld [vmem:[#allocation7 + $0x664] ss:$24 sps:$4 sm:$0xff]  }
 0x26b   :  { %2515 = vmatpush1.bf16.msra.mxu1 %v4984_v15  ;;  %2638 = vmatpush1.bf16.msra.mxu0 %v4987_v16  ;;  %v5073_v15 = vld [vmem:[#allocation7 + $0x66c] ss:$24 sps:$4 sm:$0xff]   ;;  %v5068_v16 = vld [vmem:[#allocation7 + $0x660] ss:$24 sps:$4 sm:$0xff]  }
 0x26c   :  { %2516 = vmatprep.subr.bf16.mxu1 %v4992_v17  ;;  %2639 = vmatprep.subr.bf16.mxu0 %v4995_v18  ;;  %v5071_v17 = vld [vmem:[#allocation7 + $0x668] ss:$24 sps:$4 sm:$0xff]   ;;  %v5076_v18 = vld [vmem:[#allocation7 + $0x694] ss:$24 sps:$4 sm:$0xff]  }
 0x26f   :  { %2517 = vmatpush1.bf16.msra.mxu1 %v4990_v19  ;;  %2640 = vmatpush1.bf16.msra.mxu0 %v4993_v20  ;;  %v5079_v19 = vld [vmem:[#allocation7 + $0x69c] ss:$24 sps:$4 sm:$0xff]   ;;  %v5074_v20 = vld [vmem:[#allocation7 + $0x690] ss:$24 sps:$4 sm:$0xff]  }
 0x270   :  { %2518 = vmatprep.subr.bf16.mxu1 %v4998_v21  ;;  %2641 = vmatprep.subr.bf16.mxu0 %v5001_v22  ;;  %v5077_v21 = vld [vmem:[#allocation7 + $0x698] ss:$24 sps:$4 sm:$0xff]   ;;  %v5082_v22 = vld [vmem:[#allocation7 + $0x6c4] ss:$24 sps:$4 sm:$0xff]  }
 0x273   :  { %2519 = vmatpush1.bf16.msra.mxu1 %v4996_v23  ;;  %2642 = vmatpush1.bf16.msra.mxu0 %v4999_v24  ;;  %v5085_v23 = vld [vmem:[#allocation7 + $0x6cc] ss:$24 sps:$4 sm:$0xff]   ;;  %v5080_v24 = vld [vmem:[#allocation7 + $0x6c0] ss:$24 sps:$4 sm:$0xff]  }
 0x274   :  { %2520 = vmatprep.subr.bf16.mxu1 %v5004_v25  ;;  %2643 = vmatprep.subr.bf16.mxu0 %v5007_v26  ;;  %v5083_v25 = vld [vmem:[#allocation7 + $0x6c8] ss:$24 sps:$4 sm:$0xff]   ;;  %v5088_v26 = vld [vmem:[#allocation7 + $0x6f4] ss:$24 sps:$4 sm:$0xff]  }
 0x275   :  { %v6232_v31 = vpop.f32.mrb[4].mxu0 }
 0x276   :  { %v6234_v32 = vpop.f32.mrb[5].mxu0 }
 0x277   :  { %2521 = vmatpush1.bf16.msra.mxu1 %v5002_v27  ;;  %2644 = vmatpush1.bf16.msra.mxu0 %v5005_v28  ;;  %v696_v35 = vpop.f32.mrb[6].mxu0  ;;  %v6242_v12 = vpack.c.bf16 %v6234_v32, %v6234_v32  ;;  %v5091_v27 = vld [vmem:[#allocation7 + $0x6fc] ss:$24 sps:$4 sm:$0xff]   ;;  %v5086_v28 = vld [vmem:[#allocation7 + $0x6f0] ss:$24 sps:$4 sm:$0xff]  }
 0x278   :  { %2522 = vmatprep.subr.bf16.mxu1 %v5010_v29  ;;  %2645 = vmatprep.subr.bf16.mxu0 %v5013_v30  ;;  %v697_v38 = vpop.f32.mrb[7].mxu0  ;;  %v5089_v29 = vld [vmem:[#allocation7 + $0x6f8] ss:$24 sps:$4 sm:$0xff]   ;;  %v5094_v30 = vld [vmem:[#allocation7 + $0x724] ss:$24 sps:$4 sm:$0xff]  }
 0x279   :  { %v5097_v32 = vld [vmem:[#allocation7 + $0x72c] ss:$24 sps:$4 sm:$0xff]   ;;  %v5101_v38 = vld [vmem:[#allocation7 + $0x758] ss:$24 sps:$4 sm:$0xff]  }
 0x27a   :  { %v5100_v35 = vld [vmem:[#allocation7 + $0x754] ss:$24 sps:$4 sm:$0xff]  }
 0x27b   :  { %2523 = vmatpush1.bf16.msra.mxu1 %v5008_v33  ;;  %2646 = vmatpush1.bf16.msra.mxu0 %v5011_v34  ;;  %v5092_v33 = vld [vmem:[#allocation7 + $0x720] ss:$24 sps:$4 sm:$0xff]  }
 0x27c   :  { %2524 = vmatprep.subr.bf16.mxu1 %v5016_v36  ;;  %2647 = vmatprep.subr.bf16.mxu0 %v5019_v37  ;;  %v5095_v34 = vld [vmem:[#allocation7 + $0x728] ss:$24 sps:$4 sm:$0xff]   ;;  %v5103_v36 = vld [vmem:[#allocation7 + $0x75c] ss:$24 sps:$4 sm:$0xff]  }
 0x27d   :  { %v5098_v37 = vld [vmem:[#allocation7 + $0x750] ss:$24 sps:$4 sm:$0xff]  }
 0x27f   :  { %2525 = vmatpush1.bf16.msra.mxu1 %v5014_v39  ;;  %2648 = vmatpush1.bf16.msra.mxu0 %v5017_v40  ;;  %v5106_v39 = vld [vmem:[#allocation7 + $0x784] ss:$24 sps:$4 sm:$0xff]  }
 0x280   :  { %2526 = vmatprep.subr.bf16.mxu1 %v5022_v41  ;;  %2649 = vmatprep.subr.bf16.mxu0 %v5025_v42  ;;  %v5109_v40 = vld [vmem:[#allocation7 + $0x78c] ss:$24 sps:$4 sm:$0xff]   ;;  %v5104_v41 = vld [vmem:[#allocation7 + $0x780] ss:$24 sps:$4 sm:$0xff]  }
 0x281   :  { %v5107_v42 = vld [vmem:[#allocation7 + $0x788] ss:$24 sps:$4 sm:$0xff]  }
 0x283   :  { %2527 = vmatpush1.bf16.msra.mxu1 %v5020_v43  ;;  %2650 = vmatpush1.bf16.msra.mxu0 %v5023_v44  ;;  %v5112_v43 = vld [vmem:[#allocation7 + $0x7b4] ss:$24 sps:$4 sm:$0xff]  }
 0x284   :  { %2528 = vmatprep.subr.bf16.mxu1 %v5028_v45  ;;  %2651 = vmatprep.subr.bf16.mxu0 %v5031_v46  ;;  %v5115_v44 = vld [vmem:[#allocation7 + $0x7bc] ss:$24 sps:$4 sm:$0xff]   ;;  %v5110_v45 = vld [vmem:[#allocation7 + $0x7b0] ss:$24 sps:$4 sm:$0xff]  }
 0x285   :  { %v5113_v46 = vld [vmem:[#allocation7 + $0x7b8] ss:$24 sps:$4 sm:$0xff]  }
 0x287   :  { %2529 = vmatpush1.bf16.msra.mxu1 %v5026_v47  ;;  %2652 = vmatpush1.bf16.msra.mxu0 %v5029_v48  ;;  %v5118_v47 = vld [vmem:[#allocation7 + $0x7e4] ss:$24 sps:$4 sm:$0xff]  }
 0x288   :  { %2530 = vmatprep.subr.bf16.mxu1 %v5034_v49  ;;  %2653 = vmatprep.subr.bf16.mxu0 %v5037_v50  ;;  %v5121_v48 = vld [vmem:[#allocation7 + $0x7ec] ss:$24 sps:$4 sm:$0xff]   ;;  %v5116_v49 = vld [vmem:[#allocation7 + $0x7e0] ss:$24 sps:$4 sm:$0xff]  }
 0x289   :  { %v5119_v50 = vld [vmem:[#allocation7 + $0x7e8] ss:$24 sps:$4 sm:$0xff]  }
 0x28b   :  { %2531 = vmatpush1.bf16.msra.mxu1 %v5032_v51  ;;  %2654 = vmatpush1.bf16.msra.mxu0 %v5035_v52  ;;  %v5124_v51 = vld [vmem:[#allocation7 + $0x814] ss:$24 sps:$4 sm:$0xff]  }
 0x28c   :  { %2532 = vmatprep.subr.bf16.mxu1 %v5040_v53  ;;  %2655 = vmatprep.subr.bf16.mxu0 %v5043_v54  ;;  %v5127_v52 = vld [vmem:[#allocation7 + $0x81c] ss:$24 sps:$4 sm:$0xff]   ;;  %v5122_v53 = vld [vmem:[#allocation7 + $0x810] ss:$24 sps:$4 sm:$0xff]  }
 0x28d   :  { %v5125_v54 = vld [vmem:[#allocation7 + $0x818] ss:$24 sps:$4 sm:$0xff]  }
 0x28f   :  { %2533 = vmatpush1.bf16.msra.mxu1 %v5038_v55  ;;  %2656 = vmatpush1.bf16.msra.mxu0 %v5041_v56  ;;  %v5130_v55 = vld [vmem:[#allocation7 + $0x844] ss:$24 sps:$4 sm:$0xff]  }
 0x290   :  { %2534 = vmatprep.subr.bf16.mxu1 %v5046_v58  ;;  %2657 = vmatprep.subr.bf16.mxu0 %v5049_v60  ;;  %v5133_v56 = vld [vmem:[#allocation7 + $0x84c] ss:$24 sps:$4 sm:$0xff]   ;;  %v5128_v58 = vld [vmem:[#allocation7 + $0x840] ss:$24 sps:$4 sm:$0xff]  }
 0x291   :  { %v5131_v60 = vld [vmem:[#allocation7 + $0x848] ss:$24 sps:$4 sm:$0xff]  }
 0x293   :  { %2535 = vmatpush1.bf16.msra.mxu1 %v5044_v61  ;;  %2658 = vmatpush1.bf16.msra.mxu0 %v5047_v62  ;;  %v5136_v61 = vld [vmem:[#allocation7 + $0x874] ss:$24 sps:$4 sm:$0xff]  }
 0x294   :  { %2536 = vmatprep.subr.bf16.mxu1 %v5052_v63  ;;  %2659 = vmatprep.subr.bf16.mxu0 %v5055_v0  ;;  %v5139_v62 = vld [vmem:[#allocation7 + $0x87c] ss:$24 sps:$4 sm:$0xff]   ;;  %v5134_v63 = vld [vmem:[#allocation7 + $0x870] ss:$24 sps:$4 sm:$0xff]  }
 0x295   :  { %v5137_v0 = vld [vmem:[#allocation7 + $0x878] ss:$24 sps:$4 sm:$0xff]  }
 0x297   :  { %2537 = vmatpush1.bf16.msra.mxu1 %v5050_v1  ;;  %2660 = vmatpush1.bf16.msra.mxu0 %v5053_v2  ;;  %v5142_v1 = vld [vmem:[#allocation7 + $0x8a4] ss:$24 sps:$4 sm:$0xff]  }
 0x298   :  { %2547 = vmatprep.subr.bf16.mxu1 %v5058_v3  ;;  %2670 = vmatprep.subr.bf16.mxu0 %v5061_v4  ;;  %v5145_v2 = vld [vmem:[#allocation7 + $0x8ac] ss:$24 sps:$4 sm:$0xff]   ;;  %v5140_v3 = vld [vmem:[#allocation7 + $0x8a0] ss:$24 sps:$4 sm:$0xff]  }
 0x299   :  { %v5143_v4 = vld [vmem:[#allocation7 + $0x8a8] ss:$24 sps:$4 sm:$0xff]  }
 0x29a   :  { %2539 = vmatmul.mubr.bf16.vlgmr.msra.gmra.mrb[4].mxu1 %v6238_v5  ;;  %2662 = vmatmul.mubr.bf16.vlgmr.msra.gmra.mrb[8].mxu0 %v6238_v5 }
 0x29b   :  { %2548 = vmatpush1.bf16.msra.mxu1 %v5056_v7  ;;  %2671 = vmatpush1.bf16.msra.mxu0 %v5059_v8  ;;  %v5148_v7 = vld [vmem:[#allocation7 + $0x8d4] ss:$24 sps:$4 sm:$0xff]  }
 0x29c   :  { %2549 = vmatprep.subr.bf16.mxu1 %v5064_v9  ;;  %2672 = vmatprep.subr.bf16.mxu0 %v5067_v11  ;;  %v5151_v8 = vld [vmem:[#allocation7 + $0x8dc] ss:$24 sps:$4 sm:$0xff]   ;;  %v5146_v9 = vld [vmem:[#allocation7 + $0x8d0] ss:$24 sps:$4 sm:$0xff]  }
 0x29d   :  { %2579 = vmatprep.mubr.bf16.mxu1 %v6242_v12  ;;  %2702 = vmatprep.mubr.bf16.mxu0 %v6242_v12  ;;  %v5149_v11 = vld [vmem:[#allocation7 + $0x8d8] ss:$24 sps:$4 sm:$0xff]  }
 0x29f   :  { %2550 = vmatpush1.bf16.msra.mxu1 %v5062_v6  ;;  %2673 = vmatpush1.bf16.msra.mxu0 %v5065_v13  ;;  %v5154_v6 = vld [vmem:[#allocation7 + $0x14] ss:$24 sps:$4 sm:$0xff]   ;;  %v6250_v13 = vpack.c.bf16 %v6232_v31, %v6232_v31 }
 0x2a0   :  { %2551 = vmatprep.subr.bf16.mxu1 %v5070_v14  ;;  %2674 = vmatprep.subr.bf16.mxu0 %v5073_v15  ;;  %v5152_v14 = vld [vmem:[#allocation7 + $0x10] ss:$24 sps:$4 sm:$0xff]   ;;  %v5869_v15 = vmov 0.0  }
 0x2a1   :  { %v5159_v31 = vld [vmem:[#allocation16 + $0x8] sm:$0xff]  }
 0x2a3   :  { %2552 = vmatpush1.bf16.msra.mxu1 %v5068_v16  ;;  %2675 = vmatpush1.bf16.msra.mxu0 %v5071_v17  ;;  %v5155_v16 = vld [vmem:[#allocation16] sm:$0xff]  }
 0x2a4   :  { %2553 = vmatprep.subr.bf16.mxu1 %v5076_v18  ;;  %2676 = vmatprep.subr.bf16.mxu0 %v5079_v19  ;;  %v5158_v17 = vld [vmem:[#allocation7 + $0x44] ss:$24 sps:$4 sm:$0xff]   ;;  %v5156_v18 = vld [vmem:[#allocation7 + $0x40] ss:$24 sps:$4 sm:$0xff]   ;;  %v5162_v19 = vld [vmem:[#allocation7 + $0x74] ss:$24 sps:$4 sm:$0xff]  }
 0x2a7   :  { %2554 = vmatpush1.bf16.msra.mxu1 %v5074_v20  ;;  %2677 = vmatpush1.bf16.msra.mxu0 %v5077_v21  ;;  %v5160_v20 = vld [vmem:[#allocation7 + $0x70] ss:$24 sps:$4 sm:$0xff]  }
 0x2a8   :  { %2555 = vmatprep.subr.bf16.mxu1 %v5082_v22  ;;  %2678 = vmatprep.subr.bf16.mxu0 %v5085_v23  ;;  %v5163_v21 = vld [vmem:[#allocation16 + $0x10] sm:$0xff]   ;;  %v5166_v22 = vld [vmem:[#allocation7 + $0xa4] ss:$24 sps:$4 sm:$0xff]  }
 0x2a9   :  { %v5167_v23 = vld [vmem:[#allocation16 + $0x18] sm:$0xff]  }
 0x2ab   :  { %2556 = vmatpush1.bf16.msra.mxu1 %v5080_v24  ;;  %2679 = vmatpush1.bf16.msra.mxu0 %v5083_v25  ;;  %v5170_v24 = vld [vmem:[#allocation7 + $0xd4] ss:$24 sps:$4 sm:$0xff]   ;;  %v5168_v25 = vld [vmem:[#allocation7 + $0xd0] ss:$24 sps:$4 sm:$0xff]  }
 0x2ac   :  { %2557 = vmatprep.subr.bf16.mxu1 %v5088_v26  ;;  %2680 = vmatprep.subr.bf16.mxu0 %v5091_v27  ;;  %v5171_v26 = vld [vmem:[#allocation16 + $0x20] sm:$0xff]  }
 0x2ad   :  { %v5174_v27 = vld [vmem:[#allocation7 + $0x104] ss:$24 sps:$4 sm:$0xff]  }
 0x2af   :  { %2558 = vmatpush1.bf16.msra.mxu1 %v5086_v28  ;;  %2681 = vmatpush1.bf16.msra.mxu0 %v5089_v29  ;;  %v5172_v28 = vld [vmem:[#allocation7 + $0x100] ss:$24 sps:$4 sm:$0xff]   ;;  %v5175_v29 = vld [vmem:[#allocation16 + $0x28] sm:$0xff]  }
 0x2b0   :  { %2559 = vmatprep.subr.bf16.mxu1 %v5094_v30  ;;  %2682 = vmatprep.subr.bf16.mxu0 %v5097_v32  ;;  %v5178_v30 = vld [vmem:[#allocation7 + $0x134] ss:$24 sps:$4 sm:$0xff]   ;;  %v5176_v32 = vld [vmem:[#allocation7 + $0x130] ss:$24 sps:$4 sm:$0xff]  }
 0x2b3   :  { %2560 = vmatpush1.bf16.msra.mxu1 %v5092_v33  ;;  %2683 = vmatpush1.bf16.msra.mxu0 %v5095_v34  ;;  %v5179_v33 = vld [vmem:[#allocation16 + $0x30] sm:$0xff]   ;;  %v5182_v34 = vld [vmem:[#allocation7 + $0x164] ss:$24 sps:$4 sm:$0xff]  }
 0x2b4   :  { %2561 = vmatprep.subr.bf16.mxu1 %v5100_v35  ;;  %2684 = vmatprep.subr.bf16.mxu0 %v5103_v36  ;;  %v5180_v35 = vld [vmem:[#allocation7 + $0x160] ss:$24 sps:$4 sm:$0xff]  }
 0x2b5   :  { %v5183_v36 = vld [vmem:[#allocation16 + $0x38] sm:$0xff]  }
 0x2b7   :  { %2562 = vmatpush1.bf16.msra.mxu1 %v5098_v37  ;;  %2685 = vmatpush1.bf16.msra.mxu0 %v5101_v38  ;;  %v5186_v37 = vld [vmem:[#allocation7 + $0x194] ss:$24 sps:$4 sm:$0xff]   ;;  %v5184_v38 = vld [vmem:[#allocation7 + $0x190] ss:$24 sps:$4 sm:$0xff]  }
 0x2b8   :  { %2563 = vmatprep.subr.bf16.mxu1 %v5106_v39  ;;  %2686 = vmatprep.subr.bf16.mxu0 %v5109_v40  ;;  %v6265_v39 = vld [vmem:[#allocation11] sm:$0xff]   ;;  %v5190_v40 = vld [vmem:[#allocation7 + $0x1c4] ss:$24 sps:$4 sm:$0xff]  }
 0x2bb   :  { %2564 = vmatpush1.bf16.msra.mxu1 %v5104_v41  ;;  %2687 = vmatpush1.bf16.msra.mxu0 %v5107_v42  ;;  %v5188_v41 = vld [vmem:[#allocation7 + $0x1c0] ss:$24 sps:$4 sm:$0xff]   ;;  %v5193_v42 = vld [vmem:[#allocation7 + $0x1f4] ss:$24 sps:$4 sm:$0xff]  }
 0x2bc   :  { %2565 = vmatprep.subr.bf16.mxu1 %v5112_v43  ;;  %2688 = vmatprep.subr.bf16.mxu0 %v5115_v44  ;;  %v5191_v43 = vld [vmem:[#allocation7 + $0x1f0] ss:$24 sps:$4 sm:$0xff]   ;;  %v5196_v44 = vld [vmem:[#allocation7 + $0x224] ss:$24 sps:$4 sm:$0xff]  }
 0x2bf   :  { %2566 = vmatpush1.bf16.msra.mxu1 %v5110_v45  ;;  %2689 = vmatpush1.bf16.msra.mxu0 %v5113_v46  ;;  %v5194_v45 = vld [vmem:[#allocation7 + $0x220] ss:$24 sps:$4 sm:$0xff]   ;;  %v5199_v46 = vld [vmem:[#allocation7 + $0x254] ss:$24 sps:$4 sm:$0xff]  }
 0x2c0   :  { %2567 = vmatprep.subr.bf16.mxu1 %v5118_v47  ;;  %2690 = vmatprep.subr.bf16.mxu0 %v5121_v48  ;;  %v5197_v47 = vld [vmem:[#allocation7 + $0x250] ss:$24 sps:$4 sm:$0xff]   ;;  %v5202_v48 = vld [vmem:[#allocation7 + $0x284] ss:$24 sps:$4 sm:$0xff]  }
 0x2c3   :  { %2568 = vmatpush1.bf16.msra.mxu1 %v5116_v49  ;;  %2691 = vmatpush1.bf16.msra.mxu0 %v5119_v50  ;;  %v5200_v49 = vld [vmem:[#allocation7 + $0x280] ss:$24 sps:$4 sm:$0xff]   ;;  %v5205_v50 = vld [vmem:[#allocation7 + $0x2b4] ss:$24 sps:$4 sm:$0xff]  }
 0x2c4   :  { %2569 = vmatprep.subr.bf16.mxu1 %v5124_v51  ;;  %2692 = vmatprep.subr.bf16.mxu0 %v5127_v52  ;;  %v5203_v51 = vld [vmem:[#allocation7 + $0x2b0] ss:$24 sps:$4 sm:$0xff]   ;;  %v5208_v52 = vld [vmem:[#allocation7 + $0x2e4] ss:$24 sps:$4 sm:$0xff]  }
 0x2c7   :  { %2570 = vmatpush1.bf16.msra.mxu1 %v5122_v53  ;;  %2693 = vmatpush1.bf16.msra.mxu0 %v5125_v54  ;;  %v5206_v53 = vld [vmem:[#allocation7 + $0x2e0] ss:$24 sps:$4 sm:$0xff]   ;;  %v5211_v54 = vld [vmem:[#allocation7 + $0x314] ss:$24 sps:$4 sm:$0xff]  }
 0x2c8   :  { %2571 = vmatprep.subr.bf16.mxu1 %v5130_v55  ;;  %2694 = vmatprep.subr.bf16.mxu0 %v5133_v56  ;;  %v5209_v55 = vld [vmem:[#allocation7 + $0x310] ss:$24 sps:$4 sm:$0xff]   ;;  %v5214_v56 = vld [vmem:[#allocation7 + $0x344] ss:$24 sps:$4 sm:$0xff]  }
 0x2cb   :  { %2572 = vmatpush1.bf16.msra.mxu1 %v5128_v58  ;;  %2695 = vmatpush1.bf16.msra.mxu0 %v5131_v60  ;;  %v5212_v58 = vld [vmem:[#allocation7 + $0x340] ss:$24 sps:$4 sm:$0xff]   ;;  %v5217_v60 = vld [vmem:[#allocation7 + $0x374] ss:$24 sps:$4 sm:$0xff]  }
 0x2cc   :  { %2573 = vmatprep.subr.bf16.mxu1 %v5136_v61  ;;  %2696 = vmatprep.subr.bf16.mxu0 %v5139_v62  ;;  %v5215_v61 = vld [vmem:[#allocation7 + $0x370] ss:$24 sps:$4 sm:$0xff]   ;;  %v5220_v62 = vld [vmem:[#allocation7 + $0x3a4] ss:$24 sps:$4 sm:$0xff]  }
 0x2cf   :  { %2574 = vmatpush1.bf16.msra.mxu1 %v5134_v63  ;;  %2697 = vmatpush1.bf16.msra.mxu0 %v5137_v0  ;;  %v5218_v63 = vld [vmem:[#allocation7 + $0x3a0] ss:$24 sps:$4 sm:$0xff]   ;;  %v5223_v0 = vld [vmem:[#allocation7 + $0x3d4] ss:$24 sps:$4 sm:$0xff]  }
 0x2d0   :  { %2575 = vmatprep.subr.bf16.mxu1 %v5142_v1  ;;  %2698 = vmatprep.subr.bf16.mxu0 %v5145_v2  ;;  %v5221_v1 = vld [vmem:[#allocation7 + $0x3d0] ss:$24 sps:$4 sm:$0xff]   ;;  %v5226_v2 = vld [vmem:[#allocation7 + $0x404] ss:$24 sps:$4 sm:$0xff]  }
 0x2d3   :  { %2576 = vmatpush1.bf16.msra.mxu1 %v5140_v3  ;;  %2699 = vmatpush1.bf16.msra.mxu0 %v5143_v4  ;;  %v5229_v3 = vld [vmem:[#allocation7 + $0x434] ss:$24 sps:$4 sm:$0xff]   ;;  %v5232_v4 = vld [vmem:[#allocation7 + $0x464] ss:$24 sps:$4 sm:$0xff]  }
 0x2d4   :  { %2577 = vmatprep.subr.bf16.mxu1 %v5148_v7  ;;  %2700 = vmatprep.subr.bf16.mxu0 %v5151_v8  ;;  %v5230_v7 = vld [vmem:[#allocation7 + $0x460] ss:$24 sps:$4 sm:$0xff]   ;;  %v5235_v8 = vld [vmem:[#allocation7 + $0x494] ss:$24 sps:$4 sm:$0xff]  }
 0x2d7   :  { %2578 = vmatpush1.bf16.msra.mxu1 %v5146_v9  ;;  %2701 = vmatpush1.bf16.msra.mxu0 %v5149_v11  ;;  %v5233_v9 = vld [vmem:[#allocation7 + $0x490] ss:$24 sps:$4 sm:$0xff]   ;;  %v5238_v11 = vld [vmem:[#allocation7 + $0x4c4] ss:$24 sps:$4 sm:$0xff]  }
 0x2d8   :  { %2711 = vmatprep.subr.bf16.mxu1 %v5154_v6  ;;  %4678 = vmatprep.subr.bf16.mxu0 %v5869_v15  ;;  %v5236_v6 = vld [vmem:[#allocation7 + $0x4c0] ss:$24 sps:$4 sm:$0xff]  }
 0x2da   :  { %2580 = vmatmul.mubr.bf16.vlgmr.msra.gmra.mrb[4].mxu1 %v6250_v13  ;;  %2703 = vmatmul.mubr.bf16.vlgmr.msra.gmra.mrb[8].mxu0 %v6250_v13 }
 0x2db   :  { %2712 = vmatpush1.bf16.msra.mxu1 %v5152_v14  ;;  %2743 = vmatprep.mubr.bf16.mxu1 %v6218_v57  ;;  %v5164_v57 = vld [vmem:[#allocation7 + $0xa0] ss:$24 sps:$4 sm:$0xff]   ;;  %v5241_v14 = vld [vmem:[#allocation7 + $0x4f4] ss:$24 sps:$4 sm:$0xff]  }
 0x2dc   :  { %4679 = vmatpush3.bf16.msra.mxu0 %v5155_v16  ;;  %2713 = vmatprep.subr.bf16.mxu1 %v5158_v17  ;;  %v5239_v16 = vld [vmem:[#allocation7 + $0x4f0] ss:$24 sps:$4 sm:$0xff]   ;;  %v5244_v17 = vld [vmem:[#allocation7 + $0x524] ss:$24 sps:$4 sm:$0xff]  }
 0x2dd   :  { %4680 = vmatprep.subr.bf16.mxu0 %v5869_v15  ;;  %4694 = vmatprep.mubr.msk.bf16.mxu0 %vm5870_vm0, %v5869_v15 }
 0x2df   :  { %2714 = vmatpush1.bf16.msra.mxu1 %v5156_v18  ;;  %v5242_v18 = vld [vmem:[#allocation7 + $0x520] ss:$24 sps:$4 sm:$0xff]  }
 0x2e0   :  { %4681 = vmatpush3.bf16.msra.mxu0 %v5159_v31  ;;  %2715 = vmatprep.subr.bf16.mxu1 %v5162_v19  ;;  %v5247_v31 = vld [vmem:[#allocation7 + $0x554] ss:$24 sps:$4 sm:$0xff]   ;;  %v5245_v19 = vld [vmem:[#allocation7 + $0x550] ss:$24 sps:$4 sm:$0xff]  }
 0x2e1   :  { %4682 = vmatprep.subr.bf16.mxu0 %v5869_v15 }
 0x2e3   :  { %2716 = vmatpush1.bf16.msra.mxu1 %v5160_v20  ;;  %v5250_v20 = vld [vmem:[#allocation7 + $0x584] ss:$24 sps:$4 sm:$0xff]  }
 0x2e4   :  { %4683 = vmatpush3.bf16.msra.mxu0 %v5163_v21  ;;  %2717 = vmatprep.subr.bf16.mxu1 %v5166_v22  ;;  %v5248_v21 = vld [vmem:[#allocation7 + $0x580] ss:$24 sps:$4 sm:$0xff]   ;;  %v5253_v22 = vld [vmem:[#allocation7 + $0x5b4] ss:$24 sps:$4 sm:$0xff]  }
 0x2e5   :  { %4684 = vmatprep.subr.bf16.mxu0 %v5869_v15 }
 0x2e7   :  { %2718 = vmatpush1.bf16.msra.mxu1 %v5164_v57  ;;  %v5251_v57 = vld [vmem:[#allocation7 + $0x5b0] ss:$24 sps:$4 sm:$0xff]  }
 0x2e8   :  { %4685 = vmatpush3.bf16.msra.mxu0 %v5167_v23  ;;  %2719 = vmatprep.subr.bf16.mxu1 %v5170_v24  ;;  %v5256_v23 = vld [vmem:[#allocation7 + $0x5e4] ss:$24 sps:$4 sm:$0xff]   ;;  %v5254_v24 = vld [vmem:[#allocation7 + $0x5e0] ss:$24 sps:$4 sm:$0xff]  }
 0x2e9   :  { %4686 = vmatprep.subr.bf16.mxu0 %v5869_v15 }
 0x2eb   :  { %2720 = vmatpush1.bf16.msra.mxu1 %v5168_v25  ;;  %v5259_v25 = vld [vmem:[#allocation7 + $0x614] ss:$24 sps:$4 sm:$0xff]  }
 0x2ec   :  { %4687 = vmatpush3.bf16.msra.mxu0 %v5171_v26  ;;  %2721 = vmatprep.subr.bf16.mxu1 %v5174_v27  ;;  %v5257_v26 = vld [vmem:[#allocation7 + $0x610] ss:$24 sps:$4 sm:$0xff]   ;;  %v5262_v27 = vld [vmem:[#allocation7 + $0x644] ss:$24 sps:$4 sm:$0xff]  }
 0x2ed   :  { %4688 = vmatprep.subr.bf16.mxu0 %v5869_v15 }
 0x2ef   :  { %2722 = vmatpush1.bf16.msra.mxu1 %v5172_v28  ;;  %v5260_v28 = vld [vmem:[#allocation7 + $0x640] ss:$24 sps:$4 sm:$0xff]  }
 0x2f0   :  { %4689 = vmatpush3.bf16.msra.mxu0 %v5175_v29  ;;  %2723 = vmatprep.subr.bf16.mxu1 %v5178_v30  ;;  %v5265_v29 = vld [vmem:[#allocation7 + $0x674] ss:$24 sps:$4 sm:$0xff]   ;;  %v5263_v30 = vld [vmem:[#allocation7 + $0x670] ss:$24 sps:$4 sm:$0xff]  }
 0x2f1   :  { %4690 = vmatprep.subr.bf16.mxu0 %v5869_v15 }
 0x2f3   :  { %2724 = vmatpush1.bf16.msra.mxu1 %v5176_v32  ;;  %v5268_v32 = vld [vmem:[#allocation7 + $0x6a4] ss:$24 sps:$4 sm:$0xff]  }
 0x2f4   :  { %4691 = vmatpush3.bf16.msra.mxu0 %v5179_v33  ;;  %2725 = vmatprep.subr.bf16.mxu1 %v5182_v34  ;;  %v5266_v33 = vld [vmem:[#allocation7 + $0x6a0] ss:$24 sps:$4 sm:$0xff]   ;;  %v5271_v34 = vld [vmem:[#allocation7 + $0x6d4] ss:$24 sps:$4 sm:$0xff]  }
 0x2f5   :  { %4692 = vmatprep.subr.bf16.mxu0 %v5869_v15 }
 0x2f7   :  { %2726 = vmatpush1.bf16.msra.mxu1 %v5180_v35  ;;  %v5269_v35 = vld [vmem:[#allocation7 + $0x6d0] ss:$24 sps:$4 sm:$0xff]  }
 0x2f8   :  { %4693 = vmatpush3.bf16.msra.mxu0 %v5183_v36  ;;  %2727 = vmatprep.subr.bf16.mxu1 %v5186_v37  ;;  %v5274_v36 = vld [vmem:[#allocation7 + $0x704] ss:$24 sps:$4 sm:$0xff]   ;;  %v5277_v37 = vld [vmem:[#allocation7 + $0x734] ss:$24 sps:$4 sm:$0xff]  }
 0x2f9   :  { %4698 = vmatprep.subr.bf16.mxu0 %v5869_v15 }
 0x2fb   :  { %4695 = vmatmul.mubr.bf16.vlgmr.msra.gmra.mrb[12].mxu0 %v6265_v39  ;;  %2728 = vmatpush1.bf16.msra.mxu1 %v5184_v38  ;;  %v5280_v38 = vld [vmem:[#allocation7 + $0x764] ss:$24 sps:$4 sm:$0xff]  }
 0x2fc   :  { %2729 = vmatprep.subr.bf16.mxu1 %v5190_v40  ;;  %4700 = vmatprep.mubr.msk.bf16.mxu0 %vm5870_vm0, %v5869_v15  ;;  %v5278_v40 = vld [vmem:[#allocation7 + $0x760] ss:$24 sps:$4 sm:$0xff]  }
 0x2ff   :  { %2730 = vmatpush1.bf16.msra.mxu1 %v5188_v41  ;;  %v5283_v41 = vld [vmem:[#allocation7 + $0x794] ss:$24 sps:$4 sm:$0xff]  }
 0x300   :  { %2731 = vmatprep.subr.bf16.mxu1 %v5193_v42  ;;  %v5281_v42 = vld [vmem:[#allocation7 + $0x790] ss:$24 sps:$4 sm:$0xff]  }
 0x303   :  { %2732 = vmatpush1.bf16.msra.mxu1 %v5191_v43  ;;  %v5286_v43 = vld [vmem:[#allocation7 + $0x7c4] ss:$24 sps:$4 sm:$0xff]  }
 0x304   :  { %2733 = vmatprep.subr.bf16.mxu1 %v5196_v44  ;;  %v5284_v44 = vld [vmem:[#allocation7 + $0x7c0] ss:$24 sps:$4 sm:$0xff]  }
 0x307   :  { %2734 = vmatpush1.bf16.msra.mxu1 %v5194_v45  ;;  %v5289_v45 = vld [vmem:[#allocation7 + $0x7f4] ss:$24 sps:$4 sm:$0xff]  }
 0x308   :  { %2735 = vmatprep.subr.bf16.mxu1 %v5199_v46  ;;  %v5287_v46 = vld [vmem:[#allocation7 + $0x7f0] ss:$24 sps:$4 sm:$0xff]  }
 0x30b   :  { %2736 = vmatpush1.bf16.msra.mxu1 %v5197_v47  ;;  %v5292_v47 = vld [vmem:[#allocation7 + $0x824] ss:$24 sps:$4 sm:$0xff]  }
 0x30c   :  { %2737 = vmatprep.subr.bf16.mxu1 %v5202_v48  ;;  %v5290_v48 = vld [vmem:[#allocation7 + $0x820] ss:$24 sps:$4 sm:$0xff]  }
 0x30f   :  { %2738 = vmatpush1.bf16.msra.mxu1 %v5200_v49  ;;  %v5295_v49 = vld [vmem:[#allocation7 + $0x854] ss:$24 sps:$4 sm:$0xff]  }
 0x310   :  { %2739 = vmatprep.subr.bf16.mxu1 %v5205_v50  ;;  %v5293_v50 = vld [vmem:[#allocation7 + $0x850] ss:$24 sps:$4 sm:$0xff]  }
 0x313   :  { %2740 = vmatpush1.bf16.msra.mxu1 %v5203_v51  ;;  %v5298_v51 = vld [vmem:[#allocation7 + $0x884] ss:$24 sps:$4 sm:$0xff]  }
 0x314   :  { %2741 = vmatprep.subr.bf16.mxu1 %v5208_v52  ;;  %v5296_v52 = vld [vmem:[#allocation7 + $0x880] ss:$24 sps:$4 sm:$0xff]  }
 0x317   :  { %2742 = vmatpush1.bf16.msra.mxu1 %v5206_v53  ;;  %v5301_v53 = vld [vmem:[#allocation7 + $0x8b4] ss:$24 sps:$4 sm:$0xff]  }
 0x318   :  { %2752 = vmatprep.subr.bf16.mxu1 %v5211_v54  ;;  %v5299_v54 = vld [vmem:[#allocation7 + $0x8b0] ss:$24 sps:$4 sm:$0xff]  }
 0x31a   :  { %2744 = vmatmul.mubr.bf16.vlgmr.msra.gmra.mrb[8].mxu1 %v6220_v59  ;;  %v5224_v59 = vld [vmem:[#allocation7 + $0x400] ss:$24 sps:$4 sm:$0xff]  }
 0x31b   :  { %2753 = vmatpush1.bf16.msra.mxu1 %v5209_v55  ;;  %2784 = vmatprep.mubr.bf16.mxu1 %v6228_v10  ;;  %v5227_v10 = vld [vmem:[#allocation7 + $0x430] ss:$24 sps:$4 sm:$0xff]   ;;  %v5304_v55 = vld [vmem:[#allocation7 + $0x8e4] ss:$24 sps:$4 sm:$0xff]  }
 0x31c   :  { %2754 = vmatprep.subr.bf16.mxu1 %v5214_v56  ;;  %v5302_v56 = vld [vmem:[#allocation7 + $0x8e0] ss:$24 sps:$4 sm:$0xff]  }
 0x31f   :  { %2755 = vmatpush1.bf16.msra.mxu1 %v5212_v58 }
 0x320   :  { %2756 = vmatprep.subr.bf16.mxu1 %v5217_v60 }
 0x323   :  { %2757 = vmatpush1.bf16.msra.mxu1 %v5215_v61 }
 0x324   :  { %2758 = vmatprep.subr.bf16.mxu1 %v5220_v62 }
 0x327   :  { %2759 = vmatpush1.bf16.msra.mxu1 %v5218_v63 }
 0x328   :  { %2760 = vmatprep.subr.bf16.mxu1 %v5223_v0 }
 0x32b   :  { %2761 = vmatpush1.bf16.msra.mxu1 %v5221_v1 }
 0x32c   :  { %2762 = vmatprep.subr.bf16.mxu1 %v5226_v2 }
 0x32f   :  { %2763 = vmatpush1.bf16.msra.mxu1 %v5224_v59  ;;  %v995_v59 = vlaneseq }
 0x330   :  { %2764 = vmatprep.subr.bf16.mxu1 %v5229_v3 }
 0x331   :  { %v6285_v3 = vshrl.u32 %v995_v59, 7  ;;  %v5327_v59 = vld [vmem:[#allocation19 + $0x90] sm:$0xff]  }
 0x333   :  { %2765 = vmatpush1.bf16.msra.mxu1 %v5227_v10  ;;  %v997_v10 = vsub.s32 0, %v6285_v3 }
 0x334   :  { %2766 = vmatprep.subr.bf16.mxu1 %v5232_v4 }
 0x337   :  { %2767 = vmatpush1.bf16.msra.mxu1 %v5230_v7 }
 0x338   :  { %2768 = vmatprep.subr.bf16.mxu1 %v5235_v8 }
 0x33b   :  { %2769 = vmatpush1.bf16.msra.mxu1 %v5233_v9 }
 0x33c   :  { %2770 = vmatprep.subr.bf16.mxu1 %v5238_v11 }
 0x33f   :  { %2771 = vmatpush1.bf16.msra.mxu1 %v5236_v6 }
 0x340   :  { %2772 = vmatprep.subr.bf16.mxu1 %v5241_v14 }
 0x343   :  { %2773 = vmatpush1.bf16.msra.mxu1 %v5239_v16  ;;  %v5305_v16 = vld [vmem:[#allocation13] sm:$0xff]  }
 0x344   :  { %2774 = vmatprep.subr.bf16.mxu1 %v5244_v17 }
 0x347   :  { %2775 = vmatpush1.bf16.msra.mxu1 %v5242_v18  ;;  %v6296_v18 = vld [vmem:[#allocation14] sm:$0xf] }
 0x348   :  { %2776 = vmatprep.subr.bf16.mxu1 %v5247_v31 }
 0x34b   :  { %2777 = vmatpush1.bf16.msra.mxu1 %v5245_v19  ;;  %v5306_v19 = vld [vmem:[#allocation19 + $0x40] sm:$0xff]  }
 0x34c   :  { %2778 = vmatprep.subr.bf16.mxu1 %v5250_v20  ;;  %v5307_v20 = vld [vmem:[#allocation19] sm:$0xff]  }
 0x34f   :  { %2779 = vmatpush1.bf16.msra.mxu1 %v5248_v21  ;;  %v5308_v21 = vld [vmem:[#allocation19 + $0x48] sm:$0xff]  }
 0x350   :  { %2780 = vmatprep.subr.bf16.mxu1 %v5253_v22  ;;  %v5309_v22 = vld [vmem:[#allocation19 + $0x8] sm:$0xff]  }
 0x353   :  { %2781 = vmatpush1.bf16.msra.mxu1 %v5251_v57  ;;  %v5310_v57 = vld [vmem:[#allocation19 + $0x50] sm:$0xff]  }
 0x354   :  { %2782 = vmatprep.subr.bf16.mxu1 %v5256_v23  ;;  %v5312_v23 = vld [vmem:[#allocation19 + $0x58] sm:$0xff]  }
 0x357   :  { %2783 = vmatpush1.bf16.msra.mxu1 %v5254_v24  ;;  %v5313_v24 = vld [vmem:[#allocation19 + $0x18] sm:$0xff]  }
 0x358   :  { %2793 = vmatprep.subr.bf16.mxu1 %v5259_v25  ;;  %v5314_v25 = vld [vmem:[#allocation19 + $0x60] sm:$0xff]  }
 0x35a   :  { %2785 = vmatmul.mubr.bf16.vlgmr.msra.gmra.mrb[8].mxu1 %v6238_v5  ;;  %v5272_v5 = vld [vmem:[#allocation7 + $0x700] ss:$24 sps:$4 sm:$0xff]  }
 0x35b   :  { %2794 = vmatpush1.bf16.msra.mxu1 %v5257_v26  ;;  %2825 = vmatprep.mubr.bf16.mxu1 %v6242_v12  ;;  %v5275_v12 = vld [vmem:[#allocation7 + $0x730] ss:$24 sps:$4 sm:$0xff]   ;;  %v5315_v26 = vld [vmem:[#allocation19 + $0x20] sm:$0xff]  }
 0x35c   :  { %2795 = vmatprep.subr.bf16.mxu1 %v5262_v27  ;;  %v5316_v27 = vld [vmem:[#allocation19 + $0x68] sm:$0xff]  }
 0x35f   :  { %2796 = vmatpush1.bf16.msra.mxu1 %v5260_v28  ;;  %v5317_v28 = vld [vmem:[#allocation19 + $0x28] sm:$0xff]  }
 0x360   :  { %2797 = vmatprep.subr.bf16.mxu1 %v5265_v29  ;;  %v5318_v29 = vld [vmem:[#allocation19 + $0x70] sm:$0xff]  }
 0x363   :  { %2798 = vmatpush1.bf16.msra.mxu1 %v5263_v30  ;;  %v5319_v30 = vld [vmem:[#allocation19 + $0x30] sm:$0xff]  }
 0x364   :  { %2799 = vmatprep.subr.bf16.mxu1 %v5268_v32  ;;  %v5320_v32 = vld [vmem:[#allocation19 + $0x78] sm:$0xff]  }
 0x367   :  { %2800 = vmatpush1.bf16.msra.mxu1 %v5266_v33  ;;  %v5321_v33 = vld [vmem:[#allocation19 + $0x38] sm:$0xff]  }
 0x368   :  { %2801 = vmatprep.subr.bf16.mxu1 %v5271_v34  ;;  %v5322_v34 = vld [vmem:[#allocation19 + $0xc0] sm:$0xff]  }
 0x36b   :  { %2802 = vmatpush1.bf16.msra.mxu1 %v5269_v35 }
 0x36c   :  { %2803 = vmatprep.subr.bf16.mxu1 %v5274_v36 }
 0x36f   :  { %2804 = vmatpush1.bf16.msra.mxu1 %v5272_v5 }
 0x370   :  { %2805 = vmatprep.subr.bf16.mxu1 %v5277_v37 }
 0x373   :  { %2806 = vmatpush1.bf16.msra.mxu1 %v5275_v12  ;;  %v1005_v12 = vsub.s32 2, %v6285_v3 }
 0x374   :  { %2807 = vmatprep.subr.bf16.mxu1 %v5280_v38 }
 0x377   :  { %2808 = vmatpush1.bf16.msra.mxu1 %v5278_v40 }
 0x378   :  { %2809 = vmatprep.subr.bf16.mxu1 %v5283_v41  ;;  %v4448_v41 = vld [vmem:[#allocation17] ss:$0 sm:$0xff] }
 0x37b   :  { %2810 = vmatpush1.bf16.msra.mxu1 %v5281_v42 }
 0x37c   :  { %2811 = vmatprep.subr.bf16.mxu1 %v5286_v43 }
 0x37f   :  { %2812 = vmatpush1.bf16.msra.mxu1 %v5284_v44 }
 0x380   :  { %2813 = vmatprep.subr.bf16.mxu1 %v5289_v45 }
 0x383   :  { %2814 = vmatpush1.bf16.msra.mxu1 %v5287_v46 }
 0x384   :  { %2815 = vmatprep.subr.bf16.mxu1 %v5292_v47 }
 0x387   :  { %2816 = vmatpush1.bf16.msra.mxu1 %v5290_v48 }
 0x388   :  { %2817 = vmatprep.subr.bf16.mxu1 %v5295_v49 }
 0x38b   :  { %2818 = vmatpush1.bf16.msra.mxu1 %v5293_v50 }
 0x38c   :  { %2819 = vmatprep.subr.bf16.mxu1 %v5298_v51 }
 0x38f   :  { %2820 = vmatpush1.bf16.msra.mxu1 %v5296_v52 }
 0x390   :  { %2821 = vmatprep.subr.bf16.mxu1 %v5301_v53  ;;  %v5323_v53 = vld [vmem:[#allocation19 + $0x80] sm:$0xff]  }
 0x393   :  { %2822 = vmatpush1.bf16.msra.mxu1 %v5299_v54 }
 0x394   :  { %2823 = vmatprep.subr.bf16.mxu1 %v5304_v55 }
 0x397   :  { %2824 = vmatpush1.bf16.msra.mxu1 %v5302_v56  ;;  %v5324_v56 = vld [vmem:[#allocation19 + $0xc8] sm:$0xff]  }
 0x398   :  { %4710 = vmatprep.subr.bf16.mxu1 %v5869_v15 }
 0x39a   :  { %2826 = vmatmul.mubr.bf16.vlgmr.msra.gmra.mrb[8].mxu1 %v6250_v13  ;;  %v6288_v13 = vld [vmem:[#allocation8] sm:$0x3f] }
 0x39b   :  { %4712 = vmatprep.mubr.msk.bf16.mxu1 %vm5870_vm0, %v5869_v15  ;;  %v998_v4 = vrot.slane %v6288_v13, %v997_v10  ;;  %v1006_v38 = vrot.slane %v6288_v13, %v1005_v12  ;;  %v1013_v10 = vsub.s32 4, %v6285_v3  ;;  %v5349_v12 = vld [vmem:[#allocation19 + $0x128] sm:$0xff]  }
 0x3ad   :  { %v2581_v58 = vpop.f32.mrb[4].mxu1  ;;  %v6279_v60 = vpop.f32.mrb[8].mxu0 }
 0x3ae   :  { %v6281_v61 = vpop.f32.mrb[5].mxu1  ;;  %v6283_v62 = vpop.f32.mrb[9].mxu0  ;;  %v4736_v7 = vadd.f32 %v2581_v58, %v998_v4  ;;  %v4738_v40 = vadd.f32 %v6279_v60, %v1006_v38  ;;  %v5328_v4 = vld [vmem:[#allocation19 + $0xd8] sm:$0xff]   ;;  %v5350_v38 = vld [vmem:[#allocation19 + $0x170] sm:$0xff]  }
 0x3af   :  { %v2585_v63 = vpop.f32.mrb[6].mxu1  ;;  %v2708_v0 = vpop.f32.mrb[10].mxu0 }
 0x3b0   :  { %v2586_v1 = vpop.f32.mrb[7].mxu1  ;;  %v2709_v2 = vpop.f32.mrb[11].mxu0  ;;  %5394 = vtanh.f32 %v4736_v7  ;;  %v5325_v0 = vld [vmem:[#allocation19 + $0x88] sm:$0xff]  }
 0x3b1   :  { %5396 = vtanh.f32 %v4738_v40  ;;  %v5326_v1 = vld [vmem:[#allocation19 + $0xd0] sm:$0xff]   ;;  %v1001_v2 = vsub.s32 1, %v6285_v3 }
 0x3b2   :  { %v5351_v40 = vld [vmem:[#allocation19 + $0x130] sm:$0xff]  }
 0x3b3   :  { %v1002_v7 = vrot.slane %v6288_v13, %v1001_v2 }
 0x3ba   :  { %v5395_v17 = vpop.eup %5394 }
 0x3bb   :  { %v2840_v31 = vpack.c.bf16 %v5395_v17, %v5395_v17  ;;  %v5397_v50 = vpop.eup %5396  ;;  %v5332_v17 = vld [vmem:[#allocation19 + $0xe8] sm:$0xff]  }
 0x3bc   :  { %v2842_v58 = vpack.c.bf16 %v5397_v50, %v5397_v50  ;;  %v1017_v50 = vsub.s32 5, %v6285_v3 }
 0x3ce   :  { %v3086_v8 = vpop.f32.mrb[12].mxu0 }
 0x3cf   :  { %v4696_v9 = vpop.f32.mrb[13].mxu0 }
 0x3d0   :  { %v3089_v11 = vpop.f32.mrb[14].mxu0  ;;  %v1014_v9 = vrot.slane %v6288_v13, %v1013_v10  ;;  %v5371_v10 = vld [vmem:[#allocation25] sm:$0xff]  }
 0x3d1   :  { %v3093_v6 = vpack.c.bf16 %v3089_v11, %v3086_v8  ;;  %v4697_v14 = vpop.f32.mrb[15].mxu0  ;;  %v5329_v8 = vld [vmem:[#allocation19 + $0x98] sm:$0xff]   ;;  %v5330_v11 = vld [vmem:[#allocation19 + $0xe0] sm:$0xff]  }
 0x3d2   :  { %v5331_v14 = vld [vmem:[#allocation19 + $0xa0] sm:$0xff]  }
 0x3d3   :  { %4699 = vmatpush3.bf16.msra.mxu0 %v3093_v6  ;;  %v4737_v6 = vadd.f32 %v6281_v61, %v1002_v7  ;;  %v5373_v7 = vld [vmem:[#allocation25 + $0x8] sm:$0xff]  }
 0x3d4   :  { %4704 = vmatprep.subr.bf16.mxu0 %v5869_v15 }
 0x3d5   :  { %5398 = vtanh.f32 %v4737_v6  ;;  %v5377_v6 = vld [vmem:[#allocation25 + $0x18] sm:$0xff]  }
 0x3d6   :  { %4701 = vmatmul.mubr.msk.bf16.vlgmr.msra.gmra.mrb[16].mxu0 %vm3105_vm1, %v5305_v16 }
 0x3d7   :  { %4705 = vmatpush3.bf16.msra.mxu0 %v6265_v39  ;;  %4706 = vmatprep.mubr.msk.bf16.mxu0 %vm5870_vm0, %v5869_v15  ;;  %v5311_v39 = vld [vmem:[#allocation19 + $0x10] sm:$0xff]  }
 0x3d8   :  { %4557 = vmatprep.subr.bf16.mxu0 %v5306_v19  ;;  %v5335_v19 = vld [vmem:[#allocation19 + $0xb0] sm:$0xff]  }
 0x3de   :  { %4707 = vmatmul.mubr.msk.bf16.vlgmr.msra.gmra.mrb[20].mxu0 %vm3105_vm1, %v6296_v18 }
 0x3df   :  { %3618 = vmatprep.mubr.bf16.mxu0 %v2840_v31  ;;  %4558 = vmatpush3.bf16.msra.mxu0 %v5307_v20  ;;  %v5334_v31 = vld [vmem:[#allocation19 + $0xf0] sm:$0xff]   ;;  %v5336_v20 = vld [vmem:[#allocation19 + $0xf8] sm:$0xff]   ;;  %v5399_v61 = vpop.eup %5398 }
 0x3e0   :  { %4559 = vmatprep.subr.bf16.mxu0 %v5308_v21  ;;  %v5337_v21 = vld [vmem:[#allocation19 + $0xb8] sm:$0xff]  }
 0x3e3   :  { %4560 = vmatpush3.bf16.msra.mxu0 %v5309_v22  ;;  %v5338_v22 = vld [vmem:[#allocation19 + $0x140] sm:$0xff]  }
 0x3e4   :  { %4561 = vmatprep.subr.bf16.mxu0 %v5310_v57 }
 0x3e7   :  { %4562 = vmatpush3.bf16.msra.mxu0 %v5311_v39  ;;  %v5339_v39 = vld [vmem:[#allocation19 + $0x100] sm:$0xff]  }
 0x3e8   :  { %4563 = vmatprep.subr.bf16.mxu0 %v5312_v23  ;;  %v2841_v23 = vpack.c.bf16 %v5399_v61, %v5399_v61  ;;  %v5387_v61 = vld [vmem:[#allocation28 + $0x8] sm:$0xff]  }
 0x3eb   :  { %4564 = vmatpush3.bf16.msra.mxu0 %v5313_v24  ;;  %v5340_v24 = vld [vmem:[#allocation19 + $0x148] sm:$0xff]  }
 0x3ec   :  { %4565 = vmatprep.subr.bf16.mxu0 %v5314_v25 }
 0x3ef   :  { %4566 = vmatpush3.bf16.msra.mxu0 %v5315_v26  ;;  %v5341_v26 = vld [vmem:[#allocation19 + $0x108] sm:$0xff]  }
 0x3f0   :  { %4567 = vmatprep.subr.bf16.mxu0 %v5316_v27  ;;  %v5342_v27 = vld [vmem:[#allocation19 + $0x150] sm:$0xff]  }
 0x3f3   :  { %4568 = vmatpush3.bf16.msra.mxu0 %v5317_v28  ;;  %v1009_v28 = vsub.s32 3, %v6285_v3  ;;  %v5366_v3 = vld [vmem:[#allocation19 + $0x1f0] sm:$0xff]  }
 0x3f4   :  { %4569 = vmatprep.subr.bf16.mxu0 %v5318_v29  ;;  %v5343_v29 = vld [vmem:[#allocation19 + $0x110] sm:$0xff]  }
 0x3f7   :  { %4570 = vmatpush3.bf16.msra.mxu0 %v5319_v30  ;;  %v5344_v30 = vld [vmem:[#allocation19 + $0x158] sm:$0xff]  }
 0x3f8   :  { %4571 = vmatprep.subr.bf16.mxu0 %v5320_v32  ;;  %v1010_v32 = vrot.slane %v6288_v13, %v1009_v28 }
 0x3fb   :  { %4572 = vmatpush3.bf16.msra.mxu0 %v5321_v33  ;;  %v5345_v33 = vld [vmem:[#allocation19 + $0x118] sm:$0xff]  }
 0x3fc   :  { %4579 = vmatprep.subr.bf16.mxu0 %v5322_v34  ;;  %v5346_v34 = vld [vmem:[#allocation19 + $0x160] sm:$0xff]  }
 0x46d   :  { %v2827_v35 = vpop.f32.mrb[8].mxu1 }
 0x46e   :  { %v6300_v36 = vpop.f32.mrb[9].mxu1  ;;  %v4740_v16 = vadd.f32 %v2827_v35, %v1014_v9  ;;  %v4739_v35 = vadd.f32 %v6283_v62, %v1010_v32  ;;  %v5355_v62 = vld [vmem:[#allocation19 + $0x180] sm:$0xff]   ;;  %v5375_v9 = vld [vmem:[#allocation25 + $0x10] sm:$0xff]  }
 0x46f   :  { %v2831_v5 = vpop.f32.mrb[10].mxu1 }
 0x470   :  { %v2832_v37 = vpop.f32.mrb[11].mxu1  ;;  %5400 = vtanh.f32 %v4740_v16  ;;  %v5347_v5 = vld [vmem:[#allocation19 + $0x120] sm:$0xff]  }
 0x471   :  { %v5348_v37 = vld [vmem:[#allocation19 + $0x168] sm:$0xff]   ;;  %5402 = vtanh.f32 %v4739_v35  ;;  %v4452_v35 = vld [vmem:[#allocation20] ss:$0 sm:$0xff] }
 0x472   :  { %v5379_v16 = vld [vmem:[#allocation25 + $0x20] sm:$0xff]  }
 0x47a   :  { %v5401_v57 = vpop.eup %5400 }
 0x47b   :  { %v2844_v25 = vpack.c.bf16 %v5401_v57, %v5401_v57  ;;  %v5388_v57 = vld [vmem:[#allocation28 + $0x10] sm:$0xff]  }
 0x4a9   :  { %v3143_v42 = vpop.f32.mrb[16].mxu0 }
 0x4aa   :  { %v3144_v43 = vadd.f32 %v4448_v41, %v3143_v42  ;;  %v4702_v44 = vpop.f32.mrb[17].mxu0  ;;  %v5353_v42 = vld [vmem:[#allocation19 + $0x138] sm:$0xff]  }
 0x4ab   :  { %v3146_v45 = vpop.f32.mrb[18].mxu0  ;;  %v5403_v44 = vpop.eup %5402 }
 0x4ac   :  { %v3147_v46 = vadd.f32 %v4448_v41, %v3146_v45  ;;  %v4703_v47 = vpop.f32.mrb[19].mxu0  ;;  %v3150_v48 = vmax.f32 %v3144_v43, 0.0  ;;  %v5352_v41 = vld [vmem:[#allocation19 + $0x178] sm:$0xff]   ;;  %v5354_v43 = vld [vmem:[#allocation19 + $0x1c0] sm:$0xff]   ;;  %v2843_v45 = vpack.c.bf16 %v5403_v44, %v5403_v44 }
 0x4ad   :  { %v2846_v47 = vld [vmem:[#allocation10] sm:$0xf] }
 0x4ae   :  { %v3151_v49 = vmax.f32 %v3147_v46, 0.0  ;;  %v5356_v46 = vld [vmem:[#allocation19 + $0x1c8] sm:$0xff]  }
 0x4b0   :  { %v3747_v51 = vpack.c.bf16 %v3151_v49, %v3150_v48  ;;  %v5357_v48 = vld [vmem:[#allocation19 + $0x188] sm:$0xff]   ;;  %v5358_v49 = vld [vmem:[#allocation19 + $0x1d0] sm:$0xff]  }
 0x4b1   :  { %v3189_v52 = vpop.f32.mrb[20].mxu0 }
 0x4b2   :  { %v3195_v54 = vpack.c.bf16 %v3189_v52, %v3189_v52  ;;  %v4708_v55 = vpop.f32.mrb[21].mxu0  ;;  %4711 = vmatpush3.bf16.msra.mxu1 %v3747_v51  ;;  %v5359_v51 = vld [vmem:[#allocation19 + $0x190] sm:$0xff]   ;;  %v5360_v52 = vld [vmem:[#allocation19 + $0x1d8] sm:$0xff]  }
 0x4b3   :  { %v3192_v60 = vpop.f32.mrb[22].mxu0  ;;  %v5362_v55 = vld [vmem:[#allocation19 + $0x1e0] sm:$0xff]  }
 0x4b4   :  { %3619 = vmatmul.mubr.bf16.vlgmr.msra.gmra.mrb[24].mxu0 %v3195_v54  ;;  %v4709_v63 = vpop.f32.mrb[23].mxu0  ;;  %v5361_v54 = vld [vmem:[#allocation19 + $0x198] sm:$0xff]   ;;  %v5364_v60 = vld [vmem:[#allocation19 + $0x1e8] sm:$0xff]  }
 0x4b5   :  { %4580 = vmatpush3.bf16.msra.mxu0 %v5323_v53  ;;  %3658 = vmatprep.mubr.bf16.mxu0 %v2842_v58  ;;  %v1018_v53 = vrot.slane %v6288_v13, %v1017_v50  ;;  %v5363_v58 = vld [vmem:[#allocation19 + $0x1a0] sm:$0xff]   ;;  %v5365_v63 = vld [vmem:[#allocation19 + $0x1a8] sm:$0xff]   ;;  %v5369_v13 = vld [vmem:[#allocation19 + $0x1b8] sm:$0xff]  }
 0x4b6   :  { %4581 = vmatprep.subr.bf16.mxu0 %v5324_v56  ;;  %4713 = vmatmul.mubr.msk.bf16.vlgmr.msra.gmra.mrb[12].mxu1 %vm3105_vm1, %v6296_v18  ;;  %v5333_v18 = vld [vmem:[#allocation19 + $0xa8] sm:$0xff]  }
 0x4b7   :  { %v4741_v56 = vadd.f32 %v6300_v36, %v1018_v53  ;;  %v5370_v36 = vld [vmem:[#allocation25 + $0x40] sm:$0xff]  }
 0x4b8   :  { %4647 = vmatprep.subr.bf16.mxu1 %v5370_v36 }
 0x4b9   :  { %4582 = vmatpush3.bf16.msra.mxu0 %v5325_v0  ;;  %5404 = vtanh.f32 %v4741_v56  ;;  %v5367_v0 = vld [vmem:[#allocation19 + $0x1b0] sm:$0xff]   ;;  %4648 = vmatpush3.bf16.msra.mxu1 %v5371_v10 }
 0x4ba   :  { %4583 = vmatprep.subr.bf16.mxu0 %v5326_v1  ;;  %v5368_v1 = vld [vmem:[#allocation19 + $0x1f8] sm:$0xff]  }
 0x4bd   :  { %4584 = vmatpush3.bf16.msra.mxu0 %v5327_v59 }
 0x4be   :  { %4585 = vmatprep.subr.bf16.mxu0 %v5328_v4  ;;  %v5372_v4 = vld [vmem:[#allocation25 + $0x48] sm:$0xff]  }
 0x4bf   :  { %4649 = vmatprep.subr.bf16.mxu1 %v5372_v4  ;;  %v4535_v4 = vld [vmem:[#allocation29] ss:$0 sm:$0xff] }
 0x4c0   :  { %4650 = vmatpush3.bf16.msra.mxu1 %v5373_v7 }
 0x4c1   :  { %4586 = vmatpush3.bf16.msra.mxu0 %v5329_v8  ;;  %v5374_v8 = vld [vmem:[#allocation25 + $0x50] sm:$0xff]  }
 0x4c2   :  { %4587 = vmatprep.subr.bf16.mxu0 %v5330_v11  ;;  %4651 = vmatprep.subr.bf16.mxu1 %v5374_v8  ;;  %v5376_v11 = vld [vmem:[#allocation25 + $0x58] sm:$0xff]  }
 0x4c3   :  { %v5405_v2 = vpop.eup %5404 }
 0x4c4   :  { %v2845_v59 = vpack.c.bf16 %v5405_v2, %v5405_v2  ;;  %4652 = vmatpush3.bf16.msra.mxu1 %v5375_v9 }
 0x4c5   :  { %4588 = vmatpush3.bf16.msra.mxu0 %v5331_v14  ;;  %4653 = vmatprep.subr.bf16.mxu1 %v5376_v11  ;;  %v5378_v14 = vld [vmem:[#allocation25 + $0x60] sm:$0xff]  }
 0x4c6   :  { %4589 = vmatprep.subr.bf16.mxu0 %v5332_v17  ;;  %v5380_v17 = vld [vmem:[#allocation25 + $0x68] sm:$0xff]  }
 0x4c8   :  { %4654 = vmatpush3.bf16.msra.mxu1 %v5377_v6 }
 0x4c9   :  { %4590 = vmatpush3.bf16.msra.mxu0 %v5333_v18  ;;  %4655 = vmatprep.subr.bf16.mxu1 %v5378_v14  ;;  %v5381_v18 = vld [vmem:[#allocation25 + $0x28] sm:$0xff]  }
 0x4ca   :  { %4591 = vmatprep.subr.bf16.mxu0 %v5334_v31  ;;  %v5382_v31 = vld [vmem:[#allocation25 + $0x70] sm:$0xff]  }
 0x4cc   :  { %4656 = vmatpush3.bf16.msra.mxu1 %v5379_v16 }
 0x4cd   :  { %4592 = vmatpush3.bf16.msra.mxu0 %v5335_v19  ;;  %4657 = vmatprep.subr.bf16.mxu1 %v5380_v17  ;;  %v5383_v19 = vld [vmem:[#allocation25 + $0x30] sm:$0xff]  }
 0x4ce   :  { %4593 = vmatprep.subr.bf16.mxu0 %v5336_v20  ;;  %v5384_v20 = vld [vmem:[#allocation25 + $0x78] sm:$0xff]  }
 0x4d0   :  { %4658 = vmatpush3.bf16.msra.mxu1 %v5381_v18 }
 0x4d1   :  { %4594 = vmatpush3.bf16.msra.mxu0 %v5337_v21  ;;  %4659 = vmatprep.subr.bf16.mxu1 %v5382_v31  ;;  %v5385_v21 = vld [vmem:[#allocation25 + $0x38] sm:$0xff]  }
 0x4d2   :  { %4601 = vmatprep.subr.bf16.mxu0 %v5338_v22  ;;  %v5386_v22 = vld [vmem:[#allocation28] sm:$0xff]  }
 0x4d4   :  { %3659 = vmatmul.mubr.bf16.vlgmr.msra.gmra.mrb[28].mxu0 %v2841_v23  ;;  %4660 = vmatpush3.bf16.msra.mxu1 %v5383_v19  ;;  %v5390_v23 = vld [vmem:[#allocation28 + $0x20] sm:$0xff]  }
 0x4d5   :  { %4602 = vmatpush3.bf16.msra.mxu0 %v5339_v39  ;;  %3698 = vmatprep.mubr.bf16.mxu0 %v2844_v25  ;;  %v5389_v39 = vld [vmem:[#allocation28 + $0x18] sm:$0xff]  }
 0x4d6   :  { %4603 = vmatprep.subr.bf16.mxu0 %v5340_v24  ;;  %4661 = vmatprep.subr.bf16.mxu1 %v5384_v20  ;;  %v5391_v24 = vld [vmem:[#allocation28 + $0x28] sm:$0xff]  }
 0x4d8   :  { %4662 = vmatpush3.bf16.msra.mxu1 %v5385_v21 }
 0x4d9   :  { %4604 = vmatpush3.bf16.msra.mxu0 %v5341_v26 }
 0x4da   :  { %4605 = vmatprep.subr.bf16.mxu0 %v5342_v27 }
 0x4dd   :  { %4606 = vmatpush3.bf16.msra.mxu0 %v5343_v29 }
 0x4de   :  { %4607 = vmatprep.subr.bf16.mxu0 %v5344_v30 }
 0x4e1   :  { %4608 = vmatpush3.bf16.msra.mxu0 %v5345_v33 }
 0x4e2   :  { %4609 = vmatprep.subr.bf16.mxu0 %v5346_v34 }
 0x4e5   :  { %4610 = vmatpush3.bf16.msra.mxu0 %v5347_v5 }
 0x4e6   :  { %4611 = vmatprep.subr.bf16.mxu0 %v5348_v37 }
 0x4e9   :  { %4612 = vmatpush3.bf16.msra.mxu0 %v5349_v12 }
 0x4ea   :  { %4613 = vmatprep.subr.bf16.mxu0 %v5350_v38 }
 0x4ed   :  { %4614 = vmatpush3.bf16.msra.mxu0 %v5351_v40 }
 0x4ee   :  { %4615 = vmatprep.subr.bf16.mxu0 %v5352_v41 }
 0x4f1   :  { %4616 = vmatpush3.bf16.msra.mxu0 %v5353_v42 }
 0x4f2   :  { %4623 = vmatprep.subr.bf16.mxu0 %v5354_v43 }
 0x4f4   :  { %3699 = vmatmul.mubr.bf16.vlgmr.msra.gmra.mrb[32].mxu0 %v2843_v45 }
 0x4f5   :  { %4624 = vmatpush3.bf16.msra.mxu0 %v5355_v62  ;;  %3738 = vmatprep.mubr.bf16.mxu0 %v2846_v47 }
 0x4f6   :  { %4625 = vmatprep.subr.bf16.mxu0 %v5356_v46 }
 0x4f9   :  { %4626 = vmatpush3.bf16.msra.mxu0 %v5357_v48 }
 0x4fa   :  { %4627 = vmatprep.subr.bf16.mxu0 %v5358_v49 }
 0x4fd   :  { %4628 = vmatpush3.bf16.msra.mxu0 %v5359_v51 }
 0x4fe   :  { %4629 = vmatprep.subr.bf16.mxu0 %v5360_v52 }
 0x501   :  { %4630 = vmatpush3.bf16.msra.mxu0 %v5361_v54 }
 0x502   :  { %4631 = vmatprep.subr.bf16.mxu0 %v5362_v55 }
 0x505   :  { %4632 = vmatpush3.bf16.msra.mxu0 %v5363_v58  ;;  %v5392_v58 = vld [vmem:[#allocation28 + $0x30] sm:$0xff]  }
 0x506   :  { %4633 = vmatprep.subr.bf16.mxu0 %v5364_v60  ;;  %v5393_v60 = vld [vmem:[#allocation28 + $0x38] sm:$0xff]  }
 0x509   :  { %4634 = vmatpush3.bf16.msra.mxu0 %v5365_v63 }
 0x50a   :  { %4635 = vmatprep.subr.bf16.mxu0 %v5366_v3  ;;  %v4518_v3 = vld [vmem:[#allocation26] ss:$0 sm:$0xff] }
 0x50d   :  { %4636 = vmatpush3.bf16.msra.mxu0 %v5367_v0 }
 0x50e   :  { %4637 = vmatprep.subr.bf16.mxu0 %v5368_v1 }
 0x511   :  { %4638 = vmatpush3.bf16.msra.mxu0 %v5369_v13 }
 0x512   :  { %4716 = vmatprep.subr.bf16.mxu0 %v5869_v15 }
 0x514   :  { %3739 = vmatmul.mubr.bf16.vlgmr.msra.gmra.mrb[36].mxu0 %v2845_v59 }
 0x515   :  { %4732 = vmatprep.mubr.msk.bf16.mxu0 %vm5870_vm0, %v5869_v15  ;;  %4717 = vmatpush3.bf16.msra.mxu0 %v5386_v22 }
 0x516   :  { %4718 = vmatprep.subr.bf16.mxu0 %v5869_v15 }
 0x519   :  { %4719 = vmatpush3.bf16.msra.mxu0 %v5387_v61 }
 0x51a   :  { %4720 = vmatprep.subr.bf16.mxu0 %v5869_v15 }
 0x51d   :  { %4721 = vmatpush3.bf16.msra.mxu0 %v5388_v57 }
 0x51e   :  { %4722 = vmatprep.subr.bf16.mxu0 %v5869_v15 }
 0x521   :  { %4723 = vmatpush3.bf16.msra.mxu0 %v5389_v39 }
 0x522   :  { %4724 = vmatprep.subr.bf16.mxu0 %v5869_v15 }
 0x525   :  { %4725 = vmatpush3.bf16.msra.mxu0 %v5390_v23 }
 0x526   :  { %4726 = vmatprep.subr.bf16.mxu0 %v5869_v15 }
 0x529   :  { %4727 = vmatpush3.bf16.msra.mxu0 %v5391_v24 }
 0x52a   :  { %4728 = vmatprep.subr.bf16.mxu0 %v5869_v15 }
 0x52d   :  { %4729 = vmatpush3.bf16.msra.mxu0 %v5392_v58 }
 0x52e   :  { %4730 = vmatprep.subr.bf16.mxu0 %v5869_v15 }
 0x531   :  { %4731 = vmatpush3.bf16.msra.mxu0 %v5393_v60 }
 0x587   :  { %v4573_v25 = vpop.f32.mrb[24].mxu0 }
 0x588   :  { %v4574_v26 = vpop.f32.mrb[25].mxu0 }
 0x589   :  { %v4575_v27 = vadd.f32 %v4574_v26, %v4573_v25  ;;  %v4576_v28 = vpop.f32.mrb[26].mxu0  ;;  %v3816_v29 = vpop.f32.mrb[12].mxu1 }
 0x58a   :  { %v4577_v30 = vpop.f32.mrb[27].mxu0  ;;  %v4714_v32 = vpop.f32.mrb[13].mxu1  ;;  %v3822_v55 = vpack.c.bf16 %v3816_v29, %v3816_v29 }
 0x58b   :  { %v3819_v33 = vpop.f32.mrb[14].mxu1  ;;  %v3621_v12 = vadd.f32 %v4575_v27, %v4452_v35 }
 0x58c   :  { %v4715_v34 = vpop.f32.mrb[15].mxu1 }
 0x5a7   :  { %v4595_v5 = vpop.f32.mrb[28].mxu0 }
 0x5a8   :  { %v4596_v37 = vpop.f32.mrb[29].mxu0 }
 0x5a9   :  { %v4597_v38 = vadd.f32 %v4596_v37, %v4595_v5  ;;  %v4598_v40 = vpop.f32.mrb[30].mxu0 }
 0x5aa   :  { %v4599_v41 = vpop.f32.mrb[31].mxu0 }
 0x5ab   :  { %v3661_v42 = vadd.f32 %v4597_v38, %v3621_v12 }
 0x5c7   :  { %v4617_v43 = vpop.f32.mrb[32].mxu0 }
 0x5c8   :  { %v4618_v44 = vpop.f32.mrb[33].mxu0 }
 0x5c9   :  { %v4619_v62 = vadd.f32 %v4618_v44, %v4617_v43  ;;  %v4620_v45 = vpop.f32.mrb[34].mxu0 }
 0x5ca   :  { %v4621_v46 = vpop.f32.mrb[35].mxu0 }
 0x5cb   :  { %v3701_v47 = vadd.f32 %v4619_v62, %v3661_v42 }
 0x5e7   :  { %v4639_v48 = vpop.f32.mrb[36].mxu0 }
 0x5e8   :  { %v4640_v49 = vpop.f32.mrb[37].mxu0 }
 0x5e9   :  { %v4641_v50 = vadd.f32 %v4640_v49, %v4639_v48  ;;  %v4642_v51 = vpop.f32.mrb[38].mxu0 }
 0x5ea   :  { %v4643_v52 = vpop.f32.mrb[39].mxu0 }
 0x5eb   :  { %v3741_v53 = vadd.f32 %v4641_v50, %v3701_v47 }
 0x5ed   :  { %v3746_v54 = vmax.f32 %v3741_v53, 0.0 }
 0x5ef   :  { %v3748_v56 = vpack.c.bf16 %v3746_v54, %v3746_v54 }
 0x5f1   :  { %3957 = vmatprep.mubr.bf16.mxu1 %v3748_v56 }
 0x5f2   :  { %3958 = vmatmul.mubr.bf16.vlgmr.msra.gmra.mrb[16].mxu1 %v3822_v55 }
 0x6c5   :  { %v4663_v63 = vpop.f32.mrb[16].mxu1 }
 0x6c6   :  { %v4664_v0 = vpop.f32.mrb[17].mxu1 }
 0x6c7   :  { %v4665_v1 = vadd.f32 %v4664_v0, %v4663_v63  ;;  %v4666_v13 = vpop.f32.mrb[18].mxu1 }
 0x6c8   :  { %v4667_v2 = vpop.f32.mrb[19].mxu1 }
 0x6c9   :  { %v3960_v59 = vadd.f32 %v4665_v1, %v4518_v3 }
 0x6cb   :  { %v3965_v36 = vmax.f32 %v3960_v59, 0.0 }
 0x6cd   :  { %v3966_v10 = vpack.c.bf16 %v3965_v36, %v3965_v36 }
 0x6cf   :  { %4733 = vmatmul.mubr.bf16.vlgmr.msra.gmra.mrb[40].mxu0 %v3966_v10 }
 0x7a2   :  { %v4072_v7 = vpop.f32.mrb[40].mxu0 }
 0x7a3   :  { %v4073_v8 = vadd.f32 %v4535_v4, %v4072_v7  ;;  %v4734_v9 = vpop.f32.mrb[41].mxu0 }
 0x7a4   :  { %v4075_v15 = vpop.f32.mrb[42].mxu0 }
 0x7a5   :  { %4078 = vst [vmem:[#allocation31] sm:$0xff] %v4073_v8  ;;  %v4735_v11 = vpop.f32.mrb[43].mxu0 }
 0x7a6   :  { %5813 = shalt.err (!%p5810_p8)
}
 0x7a7   :  { %s6373_s27 = sld [smem:[#allocation47_spill]] }
 0x7ad   :  { %s5814_s4 = scalar_lea.hbm %s6373_s27, 128 }
 0x7ae   :  { %p5815_p9 = scmp.ne.s32.totalorder %s6373_s27, %s5814_s4  ;;  %p5818_p10 = scmp.lt.u32.totalorder %s5814_s4, %s6373_s27 }
 0x7b0   :  { %p5820_p11 = pnand %p5818_p10, %p5815_p9 }
 0x7b2   :  { %5823 = shalt.err (!%p5820_p11)
}
 0x7b3   :  { %4088 = dma.vmem_to_hbm [thread:$0]  %s4086_s26, 128, %s6373_s27, [#allocation4]  }
 0x7b4   :  { %5844 = dma.done.wait [#allocation4], 128  }
 0x7b5   :  { %5845 = vsyncadd [#allocation4], 4294967168 }
 0x7b6   :  { %4092 = vsyncpa [#allocation3], 1 }
 0x7b7   :  { %4093 = vsyncpa [#allocation6], 1 }
 0x7b8   :  { %4094 = vsyncpa [#allocation9], 1 }
 0x7b9   :  { %4095 = vsyncpa [#allocation12], 1 }
 0x7ba   :  { %4096 = vsyncpa [#allocation15], 1 }
 0x7bb   :  { %4097 = vsyncpa [#allocation18], 1 }
 0x7bc   :  { %4098 = vsyncpa [#allocation21], 1 }
 0x7bd   :  { %4099 = vsyncpa [#allocation24], 1 }
 0x7be   :  { %4100 = vsyncpa [#allocation27], 1 }
 0x7bf   :  { %4101 = vsyncpa [#allocation30], 1 }
 0x7c0   :  { %4102 = vsyncpa [#allocation4], 1 }

</bundles_post_ra>
